<compile_context>
chip_gen: v7x
topology: tpu7x:2x2x1
jax: 0.10.0
libtpu: 0.0.40
codegen_flags: <defaults>
</compile_context>

<pallas_src>
import jax
import jax.numpy as jnp
from jax.experimental import pallas as pl
from jax.experimental.pallas import tpu as pltpu

D_HIDDEN = 1024
D_SHAPE = 10
D_SHAPE_PAD = 128          # lane-dense padding of the 10-wide shape vector
N_ITER = 3


def _round_up(n, m):
    return ((n + m - 1) // m) * m


def _hmr_shape_kernel(x_ref, w1x_ref, w1p_ref, b1_ref, a_ref, c_ref, out_ref):
    # Per-grid-step batch tile; weights are grid-invariant (resident in VMEM).
    xb = x_ref[...]                       # (TB, d_embed)   bf16
    w1x = w1x_ref[...]                    # (d_embed, 1024) bf16
    w1p = w1p_ref[...]                    # (128, 1024)     bf16 (rows 10.. are 0)
    a = a_ref[...]                        # (1024, 128)     bf16, = W2 @ W3 (cols 10.. are 0)

    # Loop-invariant fc1 contribution of x (+ bias), f32 accumulation on the MXU.
    hx = jnp.dot(xb, w1x, preferred_element_type=jnp.float32) + b1_ref[...]
    # Loop-invariant first-iteration update (pred starts at zero):
    #   d0 = hx @ (W2 W3) + (b2 W3 + b3)
    d0 = jnp.dot(hx.astype(jnp.bfloat16), a,
                 preferred_element_type=jnp.float32) + c_ref[...]

    pred = d0                              # iteration 1
    # Remaining iterations (static unroll):
    #   pred <- pred + (hx + pred @ W1p) @ A + c  ==  pred + d0 + (pred @ W1p) @ A
    for _ in range(N_ITER - 1):
        t = jnp.dot(pred.astype(jnp.bfloat16), w1p,
                    preferred_element_type=jnp.float32)
        pred = pred + d0 + jnp.dot(t.astype(jnp.bfloat16), a,
                                   preferred_element_type=jnp.float32)

    out_ref[...] = pred


def hmr_shape_regressor(x, params, *, batch_tile=256):
    """x: (B, d_embed).  params: dict from init_params()[0].  Returns (B, 10) f32."""
    batch, d_embed = x.shape

    # The kernel computes fc1 in bf16 anyway -> cast in the wrapper to halve
    # the x DMA bytes.  Pad/tile the batch in multiples of 16 (bf16 sublanes).
    x = x.astype(jnp.bfloat16)
    batch_tile = max(16, _round_up(batch_tile, 16))
    tb = min(batch_tile, _round_up(batch, 16))
    padded_b = _round_up(batch, tb)
    if padded_b != batch:
        x = jnp.pad(x, ((0, padded_b - batch), (0, 0)))
    grid = (padded_b // tb,)

    def resident(a):   # grid-invariant block: DMA'd once, stays resident in VMEM
        return pl.BlockSpec(a.shape, lambda i: (0, 0))

    weights = (params["w1x"], params["w1p"], params["b1"], params["a"], params["c"])

    out = pl.pallas_call(
        _hmr_shape_kernel,
        out_shape=jax.ShapeDtypeStruct((padded_b, D_SHAPE_PAD), jnp.float32),
        grid=grid,
        in_specs=[pl.BlockSpec((tb, d_embed), lambda i: (i, 0))]
                 + [resident(a) for a in weights],
        out_specs=pl.BlockSpec((tb, D_SHAPE_PAD), lambda i: (i, 0)),
        compiler_params=pltpu.CompilerParams(
            dimension_semantics=("parallel",),
            vmem_limit_bytes=32 << 20),
    )(x, *weights)

    return out[:batch, :D_SHAPE]


def init_params(key, d_embed):
    """Deterministic synthetic init matching the PyTorch module's shapes/init.

    Returns (kernel_params, ref_params):
      kernel_params: weights in (in, out) layout, fc1 split into w1x (bf16) and
        w1p (bf16, zero-padded to 128 rows); fc2+decshape folded offline into
        a = W2 @ W3 (bf16, 128-lane padded) and c = b2 @ W3 + b3 (f32, padded).
      ref_params: the raw f32 unfolded weights for the pure-JAX reference.
    """
    k = jax.random.split(key, 6)
    d_in = d_embed + D_SHAPE

    def uniform(kk, shape, bound):
        return jax.random.uniform(kk, shape, jnp.float32, -bound, bound)

    # fc1: Linear(d_embed+10, 1024) -- default PyTorch init bounds.
    bnd1 = 1.0 / (d_in ** 0.5)
    w1 = uniform(k[0], (d_in, D_HIDDEN), bnd1)
    b1 = uniform(k[1], (1, D_HIDDEN), bnd1)
    # fc2: Linear(1024, 1024)
    bnd2 = 1.0 / (D_HIDDEN ** 0.5)
    w2 = uniform(k[2], (D_HIDDEN, D_HIDDEN), bnd2)
    b2 = uniform(k[3], (1, D_HIDDEN), bnd2)
    # decshape: Linear(1024, 10), weight xavier_uniform gain=0.01, default bias.
    xav = 0.01 * (6.0 / (D_HIDDEN + D_SHAPE)) ** 0.5
    w3 = uniform(k[4], (D_HIDDEN, D_SHAPE), xav)
    b3 = uniform(k[5], (1, D_SHAPE), 1.0 / (D_HIDDEN ** 0.5))

    # Offline fold (valid because eval-mode dropout is identity and there is no
    # nonlinearity between fc2 and decshape).
    hp = jax.lax.Precision.HIGHEST
    a_fold = jnp.dot(w2, w3, precision=hp)              # (1024, 10)
    c_fold = jnp.dot(b2, w3, precision=hp) + b3         # (1, 10)

    a_pad = jnp.zeros((D_HIDDEN, D_SHAPE_PAD), jnp.float32).at[:, :D_SHAPE].set(a_fold)
    c_pad = jnp.zeros((1, D_SHAPE_PAD), jnp.float32).at[:, :D_SHAPE].set(c_fold)
    w1p_pad = jnp.zeros((D_SHAPE_PAD, D_HIDDEN), jnp.float32).at[:D_SHAPE].set(w1[d_embed:])

    kernel_params = {
        "w1x": w1[:d_embed].astype(jnp.bfloat16),   # streamed weight -> bf16
        "w1p": w1p_pad.astype(jnp.bfloat16),
        "b1": b1,
        "a": a_pad.astype(jnp.bfloat16),            # folded W2 @ W3 -> bf16
        "c": c_pad,                                 # folded b2 @ W3 + b3
    }
    ref_params = {"w1": w1, "b1": b1, "w2": w2, "b2": b2, "w3": w3, "b3": b3}
    return kernel_params, ref_params


def reference(x, ref_params):
    """Pure-JAX f32 port of HMRShapeRegressor.forward (eval mode), unfolded."""
    hp = jax.lax.Precision.HIGHEST
    pred = jnp.zeros((x.shape[0], D_SHAPE), jnp.float32)
    for _ in range(N_ITER):
        xc = jnp.concatenate([x, pred], axis=1)
        h = jnp.dot(xc, ref_params["w1"], precision=hp) + ref_params["b1"]
        h = jnp.dot(h, ref_params["w2"], precision=hp) + ref_params["b2"]
        pred = jnp.dot(h, ref_params["w3"], precision=hp) + ref_params["b3"] + pred
    return pred


if __name__ == "__main__":
    batch, d_embed = 2, 32
    key = jax.random.PRNGKey(0)
    kx, kp = jax.random.split(key)
    x = jax.random.normal(kx, (batch, d_embed), jnp.float32)
    kernel_params, ref_params = init_params(kp, d_embed)

    out = hmr_shape_regressor(x, kernel_params)
    out = jax.block_until_ready(out)

    ref = reference(x, ref_params)
    assert out.shape == (batch, D_SHAPE)
    assert jnp.allclose(out, ref, rtol=1e-2, atol=1e-3), (out, ref)
    print("KERNEL_OK")
</pallas_src>

<mosaic_0001>
module attributes {stable_mosaic.version = 11 : i64} {
  func.func @_hmr_shape_kernel(%arg0: i32, %arg1: memref<16x32xbf16, #tpu.memory_space<vmem>>, %arg2: memref<32x1024xbf16, #tpu.memory_space<vmem>>, %arg3: memref<128x1024xbf16, #tpu.memory_space<vmem>>, %arg4: memref<1x1024xf32, #tpu.memory_space<vmem>>, %arg5: memref<1024x128xbf16, #tpu.memory_space<vmem>>, %arg6: memref<1x128xf32, #tpu.memory_space<vmem>>, %arg7: memref<16x128xf32, #tpu.memory_space<vmem>>) attributes {dimension_semantics = [#tpu.dimension_semantics<parallel>], iteration_bounds = array<i64: 1>, scalar_prefetch = 0 : i64, scratch_operands = 0 : i64, tpu.core_type = #tpu.core_type<tc>, window_params = [{transform_indices = @transform_0, window_bounds = array<i64: 16, 32>}, {pipeline_mode = #tpu.pipeline_mode<synchronous>, transform_indices = @transform_1, window_bounds = array<i64: 32, 1024>}, {pipeline_mode = #tpu.pipeline_mode<synchronous>, transform_indices = @transform_2, window_bounds = array<i64: 128, 1024>}, {pipeline_mode = #tpu.pipeline_mode<synchronous>, transform_indices = @transform_3, window_bounds = array<i64: 1, 1024>}, {pipeline_mode = #tpu.pipeline_mode<synchronous>, transform_indices = @transform_4, window_bounds = array<i64: 1024, 128>}, {pipeline_mode = #tpu.pipeline_mode<synchronous>, transform_indices = @transform_5, window_bounds = array<i64: 1, 128>}, {transform_indices = @transform_6, window_bounds = array<i64: 16, 128>}]} {
    %c0 = arith.constant 0 : index
    %c0_0 = arith.constant 0 : index
    %0 = vector.load %arg1[%c0, %c0_0] : memref<16x32xbf16, #tpu.memory_space<vmem>>, vector<16x32xbf16>
    %c0_1 = arith.constant 0 : index
    %c0_2 = arith.constant 0 : index
    %1 = vector.load %arg2[%c0_1, %c0_2] : memref<32x1024xbf16, #tpu.memory_space<vmem>>, vector<32x1024xbf16>
    %c0_3 = arith.constant 0 : index
    %c0_4 = arith.constant 0 : index
    %2 = vector.load %arg3[%c0_3, %c0_4] : memref<128x1024xbf16, #tpu.memory_space<vmem>>, vector<128x1024xbf16>
    %c0_5 = arith.constant 0 : index
    %c0_6 = arith.constant 0 : index
    %3 = vector.load %arg5[%c0_5, %c0_6] : memref<1024x128xbf16, #tpu.memory_space<vmem>>, vector<1024x128xbf16>
    %cst = arith.constant dense<0.000000e+00> : vector<16x1024xf32>
    %4 = tpu.matmul %0, %1, %cst {dimension_numbers = #tpu.dot_dimension_numbers<[1], [0], [0], [1], [0, 0, 1, 1], [], []>} : vector<16x32xbf16>, vector<32x1024xbf16>, vector<16x1024xf32> -> vector<16x1024xf32>
    %c0_7 = arith.constant 0 : index
    %c0_8 = arith.constant 0 : index
    %5 = vector.load %arg4[%c0_7, %c0_8] : memref<1x1024xf32, #tpu.memory_space<vmem>>, vector<1x1024xf32>
    %6 = vector.broadcast %5 : vector<1x1024xf32> to vector<16x1024xf32>
    %7 = arith.addf %4, %6 : vector<16x1024xf32>
    %8 = arith.truncf %7 : vector<16x1024xf32> to vector<16x1024xbf16>
    %cst_9 = arith.constant dense<0.000000e+00> : vector<16x128xf32>
    %9 = tpu.matmul %8, %3, %cst_9 {dimension_numbers = #tpu.dot_dimension_numbers<[1], [0], [0], [1], [0, 0, 1, 1], [], []>} : vector<16x1024xbf16>, vector<1024x128xbf16>, vector<16x128xf32> -> vector<16x128xf32>
    %c0_10 = arith.constant 0 : index
    %c0_11 = arith.constant 0 : index
    %10 = vector.load %arg6[%c0_10, %c0_11] : memref<1x128xf32, #tpu.memory_space<vmem>>, vector<1x128xf32>
    %11 = vector.broadcast %10 : vector<1x128xf32> to vector<16x128xf32>
    %12 = arith.addf %9, %11 : vector<16x128xf32>
    %13 = arith.truncf %12 : vector<16x128xf32> to vector<16x128xbf16>
    %cst_12 = arith.constant dense<0.000000e+00> : vector<16x1024xf32>
    %14 = tpu.matmul %13, %2, %cst_12 {dimension_numbers = #tpu.dot_dimension_numbers<[1], [0], [0], [1], [0, 0, 1, 1], [], []>} : vector<16x128xbf16>, vector<128x1024xbf16>, vector<16x1024xf32> -> vector<16x1024xf32>
    %15 = arith.addf %12, %12 : vector<16x128xf32>
    %16 = arith.truncf %14 : vector<16x1024xf32> to vector<16x1024xbf16>
    %cst_13 = arith.constant dense<0.000000e+00> : vector<16x128xf32>
    %17 = tpu.matmul %16, %3, %cst_13 {dimension_numbers = #tpu.dot_dimension_numbers<[1], [0], [0], [1], [0, 0, 1, 1], [], []>} : vector<16x1024xbf16>, vector<1024x128xbf16>, vector<16x128xf32> -> vector<16x128xf32>
    %18 = arith.addf %15, %17 : vector<16x128xf32>
    %19 = arith.truncf %18 : vector<16x128xf32> to vector<16x128xbf16>
    %cst_14 = arith.constant dense<0.000000e+00> : vector<16x1024xf32>
    %20 = tpu.matmul %19, %2, %cst_14 {dimension_numbers = #tpu.dot_dimension_numbers<[1], [0], [0], [1], [0, 0, 1, 1], [], []>} : vector<16x128xbf16>, vector<128x1024xbf16>, vector<16x1024xf32> -> vector<16x1024xf32>
    %21 = arith.addf %18, %12 : vector<16x128xf32>
    %22 = arith.truncf %20 : vector<16x1024xf32> to vector<16x1024xbf16>
    %cst_15 = arith.constant dense<0.000000e+00> : vector<16x128xf32>
    %23 = tpu.matmul %22, %3, %cst_15 {dimension_numbers = #tpu.dot_dimension_numbers<[1], [0], [0], [1], [0, 0, 1, 1], [], []>} : vector<16x1024xbf16>, vector<1024x128xbf16>, vector<16x128xf32> -> vector<16x128xf32>
    %24 = arith.addf %21, %23 : vector<16x128xf32>
    %c0_16 = arith.constant 0 : index
    %c0_17 = arith.constant 0 : index
    %25 = vector.load %arg7[%c0_16, %c0_17] : memref<16x128xf32, #tpu.memory_space<vmem>>, vector<16x128xf32>
    tpu.vector_store %arg7[%c0_16, %c0_17], %24 {strides = array<i32>} : memref<16x128xf32, #tpu.memory_space<vmem>>, vector<16x128xf32>,
    return
  }
  func.func @transform_0(%arg0: i32) -> (i32, i32) {
    %c0_i32 = arith.constant 0 : i32
    %c0_i32_0 = arith.constant 0 : i32
    return %arg0, %c0_i32 : i32, i32
  }
  func.func @transform_1(%arg0: i32) -> (i32, i32) {
    %c0_i32 = arith.constant 0 : i32
    %c0_i32_0 = arith.constant 0 : i32
    %c0_i32_1 = arith.constant 0 : i32
    return %c0_i32, %c0_i32_0 : i32, i32
  }
  func.func @transform_2(%arg0: i32) -> (i32, i32) {
    %c0_i32 = arith.constant 0 : i32
    %c0_i32_0 = arith.constant 0 : i32
    %c0_i32_1 = arith.constant 0 : i32
    return %c0_i32, %c0_i32_0 : i32, i32
  }
  func.func @transform_3(%arg0: i32) -> (i32, i32) {
    %c0_i32 = arith.constant 0 : i32
    %c0_i32_0 = arith.constant 0 : i32
    %c0_i32_1 = arith.constant 0 : i32
    return %c0_i32, %c0_i32_0 : i32, i32
  }
  func.func @transform_4(%arg0: i32) -> (i32, i32) {
    %c0_i32 = arith.constant 0 : i32
    %c0_i32_0 = arith.constant 0 : i32
    %c0_i32_1 = arith.constant 0 : i32
    return %c0_i32, %c0_i32_0 : i32, i32
  }
  func.func @transform_5(%arg0: i32) -> (i32, i32) {
    %c0_i32 = arith.constant 0 : i32
    %c0_i32_0 = arith.constant 0 : i32
    %c0_i32_1 = arith.constant 0 : i32
    return %c0_i32, %c0_i32_0 : i32, i32
  }
  func.func @transform_6(%arg0: i32) -> (i32, i32) {
    %c0_i32 = arith.constant 0 : i32
    %c0_i32_0 = arith.constant 0 : i32
    return %arg0, %c0_i32 : i32, i32
  }
}

</mosaic_0001>

<bundles_post_ra>
// kernel: tpu_custom_call.1
= control target key start
LH: loop header
LB: loop body
LE: loop exit
PB: predicated region body
PF: predicated region fallthrough
CT: control target
= control target key end

     0   :  { %11 = vsyncpa [#allocation3], 0  ;;  %s3563_s0 = inlined_call_operand.hbm [shape: bf16[16,32], index: 0, kind: input, shape index: {}]   ;;  %s3564_s1 = inlined_call_operand.hbm [shape: bf16[32,1024], index: 1, kind: input, shape index: {}]   ;;  %s3565_s2 = inlined_call_operand.hbm [shape: bf16[128,1024], index: 2, kind: input, shape index: {}]   ;;  %s3566_s3 = inlined_call_operand.vmem [shape: f32[1,1024], index: 3, kind: input, shape index: {}]   ;;  %s3567_s4 = inlined_call_operand.hbm [shape: bf16[1024,128], index: 4, kind: input, shape index: {}]   ;;  %s3568_s5 = inlined_call_operand.vmem [shape: f32[1,128], index: 5, kind: input, shape index: {}]   ;;  %s3569_s6 = inlined_call_operand.hbm [shape: f32[16,128], index: 6, kind: output, shape index: {}]  }
   0x1   :  { %12 = vsyncpa [#allocation6], 0 }
   0x2   :  { %13 = vsyncpa [#allocation9], 0 }
   0x3   :  { %14 = vsyncpa [#allocation4], 0  ;;  %s2868_s21 = smov [#allocation5]   ;;  %s2750_s25 = scalar_lea.hbm %s3564_s1, 2048 }
   0x4   :  { %s32_s22 = sshll.u32 %s2868_s21, 4  ;;  %p2751_p0 = scmp.ne.s32.totalorder %s3564_s1, %s2750_s25  ;;  %s33_s22 = int_to_ptr.vmem [resolvable:$true] %s32_s22 }
   0x5   :  { %p2754_p1 = scmp.lt.u32.totalorder %s2750_s25, %s3564_s1 }
   0x7   :  { %p2756_p2 = pnand %p2754_p1, %p2751_p0 }
   0x9   :  { %2759 = shalt.err (!%p2756_p2)
}
   0xa   :  { %s2760_s30 = scalar_lea.vmem %s33_s22, 2048  ;;  %p2765_p4 = scmp.lt.s32.totalorder %s33_s22, %s33_s22 }
   0xb   :  { %p2761_p3 = scmp.ne.s32.totalorder %s33_s22, %s2760_s30  ;;  %p2766_p5 = scmp.lt.s32.totalorder %s2760_s30, %s2760_s30 }
   0xd   :  { %p2767_p6 = por %p2766_p5, %p2765_p4 }
   0xf   :  { %p2768_p7 = pnand %p2767_p6, %p2761_p3 }
  0x11   :  { %2771 = shalt.err (!%p2768_p7)
}
  0x12   :  { %s2869_s7 = smov 512   ;;  %s2870_s8 = smov 32  }
  0x13   :  { %38 = dma.hbm_to_vmem [thread:$0]  %s3564_s1, 2048, %s33_s22, [#allocation6], %s2869_s7, %s2869_s7, %s2870_s8  }
  0x14   :  { %s2871_s11 = smov [#allocation2]   ;;  %s2772_s15 = scalar_lea.hbm %s3563_s0, 128 }
  0x15   :  { %s20_s12 = sshll.u32 %s2871_s11, 4  ;;  %p2773_p8 = scmp.ne.s32.totalorder %s3563_s0, %s2772_s15  ;;  %s21_s12 = int_to_ptr.vmem [resolvable:$true] %s20_s12 }
  0x16   :  { %p2776_p9 = scmp.lt.u32.totalorder %s2772_s15, %s3563_s0 }
  0x18   :  { %p2778_p10 = pnand %p2776_p9, %p2773_p8 }
  0x1a   :  { %2781 = shalt.err (!%p2778_p10)
}
  0x1b   :  { %s2782_s20 = scalar_lea.vmem %s21_s12, 128  ;;  %p2787_p12 = scmp.lt.s32.totalorder %s21_s12, %s21_s12 }
  0x1c   :  { %p2783_p11 = scmp.ne.s32.totalorder %s21_s12, %s2782_s20  ;;  %p2788_p13 = scmp.lt.s32.totalorder %s2782_s20, %s2782_s20 }
  0x1e   :  { %p2789_p0 = por %p2788_p13, %p2787_p12 }
  0x20   :  { %p2790_p1 = pnand %p2789_p0, %p2783_p11 }
  0x22   :  { %2793 = shalt.err (!%p2790_p1)
}
  0x23   :  { %s2872_s1 = smov 64   ;;  %s2873_s21 = smov 4  }
  0x24   :  { %26 = dma.hbm_to_vmem [thread:$0]  %s3563_s0, 128, %s21_s12, [#allocation3], %s2872_s1, %s2872_s1, %s2873_s21  }
  0x25   :  { %s2874_s24 = smov [#allocation7]   ;;  %s2875_s26 = smov [#allocation8]  }
  0x26   :  { %s44_s25 = sshll.u32 %s2874_s24, 4  ;;  %s58_s27 = sshll.u32 %s2875_s26, 4  ;;  %s45_s25 = int_to_ptr.vmem [resolvable:$true] %s44_s25  ;;  %s2945_s27 = int_to_ptr.vmem [resolvable:$true] %s58_s27 }
  0x27   :  { %s2794_s30 = scalar_lea.hbm %s3565_s2, 8192 }
  0x28   :  { %p2795_p2 = scmp.ne.s32.totalorder %s3565_s2, %s2794_s30  ;;  %p2798_p3 = scmp.lt.u32.totalorder %s2794_s30, %s3565_s2 }
  0x2a   :  { %p2800_p4 = pnand %p2798_p3, %p2795_p2 }
  0x2c   :  { %2803 = shalt.err (!%p2800_p4)
}
  0x2d   :  { %s2804_s0 = scalar_lea.vmem %s45_s25, 8192  ;;  %p2809_p6 = scmp.lt.s32.totalorder %s45_s25, %s45_s25 }
  0x2e   :  { %p2805_p5 = scmp.ne.s32.totalorder %s45_s25, %s2804_s0  ;;  %p2810_p7 = scmp.lt.s32.totalorder %s2804_s0, %s2804_s0 }
  0x30   :  { %p2811_p8 = por %p2810_p7, %p2809_p6 }
  0x32   :  { %p2812_p9 = pnand %p2811_p8, %p2805_p5 }
  0x34   :  { %2815 = shalt.err (!%p2812_p9)
}
  0x35   :  { %50 = dma.hbm_to_vmem [thread:$0]  %s3565_s2, 8192, %s45_s25, [#allocation6], %s2869_s7, %s2869_s7, %s2870_s8  }
  0x36   :  { %s2816_s17 = scalar_lea.hbm %s3567_s4, 8192 }
  0x37   :  { %p2817_p10 = scmp.ne.s32.totalorder %s3567_s4, %s2816_s17  ;;  %p2820_p11 = scmp.lt.u32.totalorder %s2816_s17, %s3567_s4 }
  0x39   :  { %p2822_p12 = pnand %p2820_p11, %p2817_p10 }
  0x3b   :  { %2825 = shalt.err (!%p2822_p12)
}
  0x3c   :  { %s2826_s23 = scalar_lea.vmem %s2945_s27, 8192  ;;  %p2831_p0 = scmp.lt.s32.totalorder %s2945_s27, %s2945_s27 }
  0x3d   :  { %p2827_p13 = scmp.ne.s32.totalorder %s2945_s27, %s2826_s23  ;;  %p2832_p1 = scmp.lt.s32.totalorder %s2826_s23, %s2826_s23 }
  0x3f   :  { %p2833_p2 = por %p2832_p1, %p2831_p0 }
  0x41   :  { %p2834_p3 = pnand %p2833_p2, %p2827_p13 }
  0x43   :  { %2837 = shalt.err (!%p2834_p3)
}
  0x44   :  { %64 = dma.hbm_to_vmem [thread:$0]  %s3567_s4, 8192, %s2945_s27, [#allocation9], %s2872_s1, %s2872_s1, %s2873_s21  }
  0x45   :  { %2860 = dma.done.wait [#allocation3], 128  }
  0x46   :  { %2861 = vsyncadd [#allocation3], 4294967168 }
  0x47   :  { %2862 = dma.done.wait [#allocation6], 10240  }
  0x48   :  { %2863 = vsyncadd [#allocation6], 4294957056 }
  0x49   :  { %2864 = dma.done.wait [#allocation9], 8192  }
  0x4a   :  { %2865 = vsyncadd [#allocation9], 4294959104  ;;  %v3573_v0 = vmov 0   ;;  %v82_v1 = vld [vmem:[#allocation5] sm:$0xff]  ;;  %v83_v3 = vld [vmem:[#allocation5 + $0x8] sm:$0xff]  ;;  %vm417_vm0 = vcmask 261120  }
  0x4b   :  { %453 = vmatprep.mubr.bf16.mxu0 %v3573_v0  ;;  %496 = vmatprep.mubr.bf16.mxu1 %v3573_v0  ;;  %v86_v2 = vld [vmem:[#allocation5 + $0x20] sm:$0xff]  ;;  %v87_v5 = vld [vmem:[#allocation5 + $0x28] sm:$0xff]  ;;  %v84_v15 = vld [vmem:[#allocation5 + $0x10] sm:$0xff] }
  0x4c   :  { %v2197_v4 = vcombine.high %v82_v1, %v86_v2  ;;  %v2196_v6 = vcombine.low %v82_v1, %v86_v2  ;;  %v90_v7 = vld [vmem:[#allocation5 + $0x40] sm:$0xff]  ;;  %v2199_v9 = vcombine.high %v83_v3, %v87_v5  ;;  %v2198_v10 = vcombine.low %v83_v3, %v87_v5  ;;  %v91_v12 = vld [vmem:[#allocation5 + $0x48] sm:$0xff]  ;;  %v88_v17 = vld [vmem:[#allocation5 + $0x30] sm:$0xff] }
  0x4d   :  { %v94_v8 = vld [vmem:[#allocation5 + $0x60] sm:$0xff]  ;;  %v95_v13 = vld [vmem:[#allocation5 + $0x68] sm:$0xff]  ;;  %v85_v18 = vld [vmem:[#allocation5 + $0x18] sm:$0xff]  ;;  %v2201_v22 = vcombine.high %v84_v15, %v88_v17  ;;  %v2200_v28 = vcombine.low %v84_v15, %v88_v17  ;;  %v292_v5 = vlaneseq }
  0x4e   :  { %v2205_v11 = vcombine.high %v90_v7, %v94_v8  ;;  %421 = vmatprep.subr.bf16.mxu0 %v2197_v4  ;;  %v2207_v14 = vcombine.high %v91_v12, %v95_v13  ;;  %464 = vmatprep.subr.bf16.mxu1 %v2199_v9  ;;  %v2204_v16 = vcombine.low %v90_v7, %v94_v8  ;;  %v89_v19 = vld [vmem:[#allocation5 + $0x38] sm:$0xff]  ;;  %v92_v23 = vld [vmem:[#allocation5 + $0x50] sm:$0xff]  ;;  %v2622_v34 = vld [vmem:[#allocation8 + $0x40] sm:$0xff]  }
  0x4f   :  { %422 = vmatpush1.bf16.msra.mxu0 %v2196_v6  ;;  %465 = vmatpush1.bf16.msra.mxu1 %v2198_v10  ;;  %v2206_v20 = vcombine.low %v91_v12, %v95_v13  ;;  %v2621_v21 = vld [vmem:[#allocation2] sm:$0xff]   ;;  %v96_v24 = vld [vmem:[#allocation5 + $0x70] sm:$0xff]  ;;  %v2203_v25 = vcombine.high %v85_v18, %v89_v19  ;;  %v2202_v29 = vcombine.low %v85_v18, %v89_v19  ;;  %v2623_v35 = vld [vmem:[#allocation8 + $0xc0] sm:$0xff]   ;;  %v293_v6 = vshrl.u32 %v292_v5, 7 }
  0x50   :  { %423 = vmatprep.subr.bf16.mxu0 %v2205_v11  ;;  %466 = vmatprep.subr.bf16.mxu1 %v2207_v14  ;;  %v93_v26 = vld [vmem:[#allocation5 + $0x58] sm:$0xff]  ;;  %v2209_v30 = vcombine.high %v92_v23, %v96_v24  ;;  %v2208_v32 = vcombine.low %v92_v23, %v96_v24  ;;  %v2624_v36 = vld [vmem:[#allocation8] sm:$0xff]   ;;  %v2626_v38 = vld [vmem:[#allocation8 + $0x48] sm:$0xff]  }
  0x51   :  { %v97_v27 = vld [vmem:[#allocation5 + $0x78] sm:$0xff]  ;;  %v2625_v37 = vld [vmem:[#allocation8 + $0x80] sm:$0xff]   ;;  %v2627_v39 = vld [vmem:[#allocation8 + $0xc8] sm:$0xff]   ;;  %v302_v7 = vsub.s32 2, %v293_v6  ;;  %v294_v8 = vsub.s32 0, %v293_v6  ;;  %v306_v9 = vsub.s32 3, %v293_v6 }
  0x52   :  { %v2211_v31 = vcombine.high %v93_v26, %v97_v27  ;;  %v2210_v33 = vcombine.low %v93_v26, %v97_v27  ;;  %v2628_v40 = vld [vmem:[#allocation8 + $0x8] sm:$0xff]   ;;  %v2630_v42 = vld [vmem:[#allocation8 + $0x50] sm:$0xff]   ;;  %v2990_v46 = vld [vmem:[#allocation8 + $0x58] sm:$0xff]   ;;  %v298_v11 = vsub.s32 1, %v293_v6  ;;  %v310_v19 = vsub.s32 4, %v293_v6 }
  0x53   :  { %424 = vmatpush1.bf16.msra.mxu0 %v2204_v16  ;;  %467 = vmatpush1.bf16.msra.mxu1 %v2206_v20  ;;  %v2629_v41 = vld [vmem:[#allocation8 + $0x88] sm:$0xff]   ;;  %v2631_v43 = vld [vmem:[#allocation8 + $0xd0] sm:$0xff]   ;;  %v2992_v47 = vld [vmem:[#allocation8 + $0xd8] sm:$0xff]   ;;  %v314_v23 = vsub.s32 5, %v293_v6  ;;  %v318_v24 = vsub.s32 6, %v293_v6 }
  0x54   :  { %507 = vmatprep.subr.bf16.mxu0 %v2201_v22  ;;  %550 = vmatprep.subr.bf16.mxu1 %v2203_v25  ;;  %v2632_v44 = vld [vmem:[#allocation8 + $0x10] sm:$0xff]   ;;  %v2994_v48 = vld [vmem:[#allocation8 + $0x18] sm:$0xff]   ;;  %v2999_v50 = vld [vmem:[#allocation8 + $0x60] sm:$0xff]  }
  0x55   :  { %v2633_v45 = vld [vmem:[#allocation8 + $0x90] sm:$0xff]   ;;  %v2996_v49 = vld [vmem:[#allocation8 + $0x98] sm:$0xff]   ;;  %v3002_v51 = vld [vmem:[#allocation8 + $0xe0] sm:$0xff]  }
  0x56   :  { %2212 = vmatmul.mubr.msk.bf16.vlgmr.msra.gmra.mrb[0].mxu0 %vm417_vm0, %v2621_v21  ;;  %2213 = vmatmul.mubr.msk.bf16.vlgmr.msra.gmra.mrb[0].mxu1 %vm417_vm0, %v2621_v21  ;;  %v3004_v52 = vld [vmem:[#allocation8 + $0x20] sm:$0xff]   ;;  %v3008_v54 = vld [vmem:[#allocation8 + $0x68] sm:$0xff]   ;;  %v3026_v58 = vld [vmem:[#allocation8 + $0x70] sm:$0xff]  }
  0x57   :  { %508 = vmatpush1.bf16.msra.mxu0 %v2200_v28  ;;  %551 = vmatpush1.bf16.msra.mxu1 %v2202_v29  ;;  %v3006_v53 = vld [vmem:[#allocation8 + $0xa0] sm:$0xff]   ;;  %v3011_v55 = vld [vmem:[#allocation8 + $0xe8] sm:$0xff]   ;;  %v3028_v59 = vld [vmem:[#allocation8 + $0xf0] sm:$0xff]  }
  0x58   :  { %509 = vmatprep.subr.bf16.mxu0 %v2209_v30  ;;  %552 = vmatprep.subr.bf16.mxu1 %v2211_v31  ;;  %v3016_v56 = vld [vmem:[#allocation8 + $0x28] sm:$0xff]   ;;  %v3030_v60 = vld [vmem:[#allocation8 + $0x30] sm:$0xff]   ;;  %v3038_v62 = vld [vmem:[#allocation8 + $0x78] sm:$0xff]   ;;  %v322_v30 = vsub.s32 7, %v293_v6 }
  0x59   :  { %539 = vmatprep.mubr.bf16.mxu0 %v3573_v0  ;;  %582 = vmatprep.mubr.bf16.mxu1 %v3573_v0  ;;  %v3018_v57 = vld [vmem:[#allocation8 + $0xa8] sm:$0xff]   ;;  %v3032_v61 = vld [vmem:[#allocation8 + $0xb0] sm:$0xff]   ;;  %v3040_v63 = vld [vmem:[#allocation8 + $0xf8] sm:$0xff]  }
  0x5a   :  { %v3042_v1 = vld [vmem:[#allocation8 + $0x38] sm:$0xff]   ;;  %v3050_v3 = vld [vmem:[#allocation8 + $0x140] sm:$0xff]   ;;  %v3065_v6 = vld [vmem:[#allocation8 + $0x1c8] sm:$0xff]  }
  0x5b   :  { %510 = vmatpush1.bf16.msra.mxu0 %v2208_v32  ;;  %553 = vmatpush1.bf16.msra.mxu1 %v2210_v33  ;;  %v3044_v2 = vld [vmem:[#allocation8 + $0xb8] sm:$0xff]   ;;  %v3052_v4 = vld [vmem:[#allocation8 + $0x1c0] sm:$0xff]  }
  0x5c   :  { %2345 = vmatprep.subr.bf16.mxu0 %v2622_v34  ;;  %2367 = vmatprep.subr.bf16.mxu1 %v2623_v35  ;;  %v290_v10 = vld [vmem:[%s3566_s3] sm:$0xff] }
  0x5d   :  { %v303_v12 = vrot.slane %v290_v10, %v302_v7  ;;  %v295_v13 = vrot.slane %v290_v10, %v294_v8  ;;  %v307_v14 = vrot.slane %v290_v10, %v306_v9  ;;  %v299_v16 = vrot.slane %v290_v10, %v298_v11 }
  0x5e   :  { %2214 = vmatmul.mubr.msk.bf16.vlgmr.msra.gmra.mrb[4].mxu0 %vm417_vm0, %v2621_v21  ;;  %2215 = vmatmul.mubr.msk.bf16.vlgmr.msra.gmra.mrb[4].mxu1 %vm417_vm0, %v2621_v21  ;;  %v323_v5 = vrot.slane %v290_v10, %v322_v30 }
  0x5f   :  { %2346 = vmatpush3.bf16.msra.mxu0 %v2624_v36  ;;  %2368 = vmatpush3.bf16.msra.mxu1 %v2625_v37  ;;  %v311_v37 = vrot.slane %v290_v10, %v310_v19 }
  0x60   :  { %2347 = vmatprep.subr.bf16.mxu0 %v2626_v38  ;;  %2369 = vmatprep.subr.bf16.mxu1 %v2627_v39 }
  0x63   :  { %2348 = vmatpush3.bf16.msra.mxu0 %v2628_v40  ;;  %2370 = vmatpush3.bf16.msra.mxu1 %v2629_v41  ;;  %v3059_v40 = vld [vmem:[#allocation8 + $0x100] sm:$0xff]   ;;  %v315_v41 = vrot.slane %v290_v10, %v314_v23 }
  0x64   :  { %2349 = vmatprep.subr.bf16.mxu0 %v2630_v42  ;;  %2371 = vmatprep.subr.bf16.mxu1 %v2631_v43  ;;  %v319_v42 = vrot.slane %v290_v10, %v318_v24 }
  0x67   :  { %2350 = vmatpush3.bf16.msra.mxu0 %v2632_v44  ;;  %2372 = vmatpush3.bf16.msra.mxu1 %v2633_v45  ;;  %v3061_v44 = vld [vmem:[#allocation8 + $0x180] sm:$0xff]   ;;  %v3063_v45 = vld [vmem:[#allocation8 + $0x148] sm:$0xff]  }
  0x68   :  { %2351 = vmatprep.subr.bf16.mxu0 %v2990_v46  ;;  %2373 = vmatprep.subr.bf16.mxu1 %v2992_v47 }
  0x6b   :  { %2352 = vmatpush3.bf16.msra.mxu0 %v2994_v48  ;;  %2374 = vmatpush3.bf16.msra.mxu1 %v2996_v49 }
  0x6c   :  { %2353 = vmatprep.subr.bf16.mxu0 %v2999_v50  ;;  %2375 = vmatprep.subr.bf16.mxu1 %v3002_v51 }
  0x6f   :  { %2354 = vmatpush3.bf16.msra.mxu0 %v3004_v52  ;;  %2376 = vmatpush3.bf16.msra.mxu1 %v3006_v53 }
  0x70   :  { %2355 = vmatprep.subr.bf16.mxu0 %v3008_v54  ;;  %2377 = vmatprep.subr.bf16.mxu1 %v3011_v55 }
  0x73   :  { %2356 = vmatpush3.bf16.msra.mxu0 %v3016_v56  ;;  %2378 = vmatpush3.bf16.msra.mxu1 %v3018_v57 }
  0x74   :  { %2357 = vmatprep.subr.bf16.mxu0 %v3026_v58  ;;  %2379 = vmatprep.subr.bf16.mxu1 %v3028_v59 }
  0x77   :  { %2358 = vmatpush3.bf16.msra.mxu0 %v3030_v60  ;;  %2380 = vmatpush3.bf16.msra.mxu1 %v3032_v61 }
  0x78   :  { %2359 = vmatprep.subr.bf16.mxu0 %v3038_v62  ;;  %2381 = vmatprep.subr.bf16.mxu1 %v3040_v63 }
  0x7b   :  { %2360 = vmatpush3.bf16.msra.mxu0 %v3042_v1  ;;  %2382 = vmatpush3.bf16.msra.mxu1 %v3044_v2 }
  0x7c   :  { %2389 = vmatprep.subr.bf16.mxu0 %v3050_v3  ;;  %2411 = vmatprep.subr.bf16.mxu1 %v3052_v4 }
 0x129   :  { %v455_v15 = vpop.f32.mrb[0].mxu0  ;;  %v498_v17 = vpop.f32.mrb[0].mxu1 }
 0x12a   :  { %v457_v18 = vpop.f32.mrb[1].mxu0  ;;  %v499_v20 = vadd.f32 %v498_v17, %v303_v12  ;;  %v500_v21 = vpop.f32.mrb[1].mxu1  ;;  %v456_v25 = vadd.f32 %v455_v15, %v295_v13  ;;  %v3078_v17 = vld [vmem:[#allocation8 + $0x150] sm:$0xff]  }
 0x12b   :  { %v459_v22 = vpop.f32.mrb[2].mxu0  ;;  %v501_v26 = vadd.f32 %v500_v21, %v307_v14  ;;  %v502_v28 = vpop.f32.mrb[2].mxu1  ;;  %v458_v31 = vadd.f32 %v457_v18, %v299_v16 }
 0x12c   :  { %v460_v27 = vadd.f32 %v459_v22, %v295_v13  ;;  %v461_v29 = vpop.f32.mrb[3].mxu0  ;;  %v503_v32 = vadd.f32 %v502_v28, %v303_v12  ;;  %v504_v34 = vpop.f32.mrb[3].mxu1  ;;  %v3070_v12 = vld [vmem:[#allocation8 + $0x108] sm:$0xff]   ;;  %v3083_v22 = vld [vmem:[#allocation8 + $0x1d0] sm:$0xff]  }
 0x12d   :  { %v462_v33 = vadd.f32 %v461_v29, %v299_v16  ;;  %v505_v36 = vadd.f32 %v504_v34, %v307_v14  ;;  %v3076_v16 = vld [vmem:[#allocation8 + $0x188] sm:$0xff]   ;;  %v3088_v28 = vld [vmem:[#allocation8 + $0x110] sm:$0xff]   ;;  %v3098_v34 = vld [vmem:[#allocation8 + $0x1d8] sm:$0xff]  }
 0x12e   :  { %v593_v35 = vpack.c.bf16 %v460_v27, %v456_v25  ;;  %v595_v38 = vpack.c.bf16 %v503_v32, %v499_v20  ;;  %v3095_v32 = vld [vmem:[#allocation8 + $0x158] sm:$0xff]  }
 0x12f   :  { %v594_v39 = vpack.c.bf16 %v462_v33, %v458_v31  ;;  %v596_v43 = vpack.c.bf16 %v505_v36, %v501_v26  ;;  %v3093_v31 = vld [vmem:[#allocation8 + $0x190] sm:$0xff]   ;;  %v3105_v36 = vld [vmem:[#allocation8 + $0x198] sm:$0xff]  }
 0x131   :  { %1024 = vmatprep.mubr.bf16.mxu0 %v594_v39  ;;  %v541_v7 = vpop.f32.mrb[4].mxu0  ;;  %1065 = vmatprep.mubr.bf16.mxu1 %v596_v43  ;;  %v584_v11 = vpop.f32.mrb[4].mxu1  ;;  %v3113_v39 = vld [vmem:[#allocation8 + $0x120] sm:$0xff]   ;;  %v3122_v43 = vld [vmem:[#allocation8 + $0x1e8] sm:$0xff]  }
 0x132   :  { %1025 = vmatmul.mubr.bf16.vlgmr.msra.gmra.mrb[8].mxu0 %v593_v35  ;;  %v3067_v8 = vadd.f32 %v541_v7, %v311_v37  ;;  %v543_v9 = vpop.f32.mrb[5].mxu0  ;;  %1066 = vmatmul.mubr.bf16.vlgmr.msra.gmra.mrb[8].mxu1 %v595_v38  ;;  %v3072_v15 = vadd.f32 %v584_v11, %v319_v42  ;;  %v586_v10 = vpop.f32.mrb[5].mxu1  ;;  %v3101_v35 = vld [vmem:[#allocation8 + $0x118] sm:$0xff]   ;;  %v3110_v38 = vld [vmem:[#allocation8 + $0x1e0] sm:$0xff]   ;;  %3641 = vst [vmem:[#allocation17_spill] sm:$0xff] %v3113_v39  ;;  %3644 = vst [vmem:[#allocation20_spill] sm:$0xff] %v3122_v43 }
 0x133   :  { %2390 = vmatpush3.bf16.msra.mxu0 %v3059_v40  ;;  %v544_v13 = vadd.f32 %v543_v9, %v315_v41  ;;  %v545_v14 = vpop.f32.mrb[6].mxu0  ;;  %2412 = vmatpush3.bf16.msra.mxu1 %v3061_v44  ;;  %v587_v20 = vadd.f32 %v586_v10, %v323_v5  ;;  %v588_v21 = vpop.f32.mrb[6].mxu1  ;;  %3640 = vst [vmem:[#allocation16_spill] sm:$0xff] %v3110_v38  ;;  %v3129_v7 = vld [vmem:[#allocation8 + $0x1a8] sm:$0xff]   ;;  %v3134_v9 = vld [vmem:[#allocation8 + $0x1f0] sm:$0xff]   ;;  %v3149_v10 = vld [vmem:[#allocation8 + $0x138] sm:$0xff]  }
 0x134   :  { %2391 = vmatprep.subr.bf16.mxu0 %v3063_v45  ;;  %v3080_v18 = vadd.f32 %v545_v14, %v311_v37  ;;  %v547_v19 = vpop.f32.mrb[7].mxu0  ;;  %2413 = vmatprep.subr.bf16.mxu1 %v3065_v6  ;;  %v589_v24 = vadd.f32 %v588_v21, %v319_v42  ;;  %v590_v25 = vpop.f32.mrb[7].mxu1  ;;  %v3107_v37 = vld [vmem:[#allocation8 + $0x160] sm:$0xff]   ;;  %v3119_v42 = vld [vmem:[#allocation8 + $0x168] sm:$0xff]   ;;  %3646 = vst [vmem:[#allocation22_spill] sm:$0xff] %v3129_v7  ;;  %3648 = vst [vmem:[#allocation24_spill] sm:$0xff] %v3134_v9 }
 0x135   :  { %v548_v23 = vadd.f32 %v547_v19, %v315_v41  ;;  %v591_v27 = vadd.f32 %v590_v25, %v323_v5  ;;  %3639 = vst [vmem:[#allocation15_spill] sm:$0xff] %v3107_v37  ;;  %v3117_v41 = vld [vmem:[#allocation8 + $0x1a0] sm:$0xff]   ;;  %3643 = vst [vmem:[#allocation19_spill] sm:$0xff] %v3119_v42  ;;  %v3125_v5 = vld [vmem:[#allocation8 + $0x128] sm:$0xff]  }
 0x136   :  { %v597_v26 = vpack.c.bf16 %v3080_v18, %v3067_v8  ;;  %v599_v30 = vpack.c.bf16 %v589_v24, %v3072_v15  ;;  %3642 = vst [vmem:[#allocation18_spill] sm:$0xff] %v3117_v41  ;;  %3645 = vst [vmem:[#allocation21_spill] sm:$0xff] %v3125_v5  ;;  %v3131_v8 = vld [vmem:[#allocation8 + $0x170] sm:$0xff]   ;;  %v3143_v14 = vld [vmem:[#allocation8 + $0x178] sm:$0xff]  }
 0x137   :  { %2392 = vmatpush3.bf16.msra.mxu0 %v3070_v12  ;;  %v598_v29 = vpack.c.bf16 %v548_v23, %v544_v13  ;;  %2414 = vmatpush3.bf16.msra.mxu1 %v3076_v16  ;;  %v600_v33 = vpack.c.bf16 %v591_v27, %v587_v20  ;;  %3647 = vst [vmem:[#allocation23_spill] sm:$0xff] %v3131_v8  ;;  %v3137_v11 = vld [vmem:[#allocation8 + $0x130] sm:$0xff]   ;;  %3651 = vst [vmem:[#allocation27_spill] sm:$0xff] %v3143_v14  ;;  %v3146_v15 = vld [vmem:[#allocation8 + $0x1f8] sm:$0xff]  }
 0x138   :  { %2393 = vmatprep.subr.bf16.mxu0 %v3078_v17  ;;  %2415 = vmatprep.subr.bf16.mxu1 %v3083_v22  ;;  %3649 = vst [vmem:[#allocation25_spill] sm:$0xff] %v3137_v11  ;;  %v3141_v13 = vld [vmem:[#allocation8 + $0x1b0] sm:$0xff]   ;;  %3652 = vst [vmem:[#allocation28_spill] sm:$0xff] %v3146_v15  ;;  %v3153_v18 = vld [vmem:[#allocation8 + $0x1b8] sm:$0xff]  }
 0x139   :  { %1106 = vmatprep.mubr.bf16.mxu0 %v598_v29  ;;  %1147 = vmatprep.mubr.bf16.mxu1 %v600_v33  ;;  %3650 = vst [vmem:[#allocation26_spill] sm:$0xff] %v3141_v13  ;;  %3653 = vst [vmem:[#allocation29_spill] sm:$0xff] %v3149_v10  ;;  %v98_v19 = vld [vmem:[#allocation7] sm:$0xff]  ;;  %v99_v21 = vld [vmem:[#allocation7 + $0x8] sm:$0xff] }
 0x13a   :  { %3654 = vst [vmem:[#allocation30_spill] sm:$0xff] %v3153_v18  ;;  %v102_v20 = vld [vmem:[#allocation7 + $0x20] sm:$0xff]  ;;  %v103_v25 = vld [vmem:[#allocation7 + $0x28] sm:$0xff] }
 0x13b   :  { %2394 = vmatpush3.bf16.msra.mxu0 %v3088_v28  ;;  %2416 = vmatpush3.bf16.msra.mxu1 %v3093_v31  ;;  %v3160_v23 = vcombine.low %v98_v19, %v102_v20  ;;  %v3162_v24 = vcombine.high %v98_v19, %v102_v20  ;;  %v106_v27 = vld [vmem:[#allocation7 + $0x40] sm:$0xff]  ;;  %v3164_v33 = vcombine.low %v99_v21, %v103_v25  ;;  %v119_v19 = vld [vmem:[#allocation7 + $0xa8] sm:$0xff] }
 0x13c   :  { %2395 = vmatprep.subr.bf16.mxu0 %v3095_v32  ;;  %2417 = vmatprep.subr.bf16.mxu1 %v3098_v34  ;;  %v110_v29 = vld [vmem:[#allocation7 + $0x60] sm:$0xff] }
 0x13d   :  { %3655 = vst [vmem:[#allocation31_spill] sm:$0xff] %v3160_v23  ;;  %3656 = vst [vmem:[#allocation32_spill] sm:$0xff] %v3162_v24  ;;  %v3175_v20 = vcombine.low %v106_v27, %v110_v29 }
 0x13e   :  { %3657 = vst [vmem:[#allocation33_spill] sm:$0xff] %v3164_v33 }
 0x13f   :  { %2396 = vmatpush3.bf16.msra.mxu0 %v3101_v35  ;;  %2418 = vmatpush3.bf16.msra.mxu1 %v3105_v36  ;;  %3661 = vst [vmem:[#allocation37_spill] sm:$0xff] %v3175_v20 }
 0x140   :  { %2397 = vmatprep.subr.bf16.mxu0 %v3107_v37  ;;  %2419 = vmatprep.subr.bf16.mxu1 %v3110_v38 }
 0x143   :  { %2398 = vmatpush3.bf16.msra.mxu0 %v3113_v39  ;;  %2420 = vmatpush3.bf16.msra.mxu1 %v3117_v41 }
 0x144   :  { %2399 = vmatprep.subr.bf16.mxu0 %v3119_v42  ;;  %2421 = vmatprep.subr.bf16.mxu1 %v3122_v43 }
 0x147   :  { %2400 = vmatpush3.bf16.msra.mxu0 %v3125_v5  ;;  %2422 = vmatpush3.bf16.msra.mxu1 %v3129_v7 }
 0x148   :  { %2401 = vmatprep.subr.bf16.mxu0 %v3131_v8  ;;  %2423 = vmatprep.subr.bf16.mxu1 %v3134_v9  ;;  %v126_v9 = vld [vmem:[#allocation7 + $0xe0] sm:$0xff]  ;;  %v123_v8 = vld [vmem:[#allocation7 + $0xc8] sm:$0xff] }
 0x14b   :  { %2402 = vmatpush3.bf16.msra.mxu0 %v3137_v11  ;;  %2424 = vmatpush3.bf16.msra.mxu1 %v3141_v13  ;;  %v115_v13 = vld [vmem:[#allocation7 + $0x88] sm:$0xff]  ;;  %v122_v11 = vld [vmem:[#allocation7 + $0xc0] sm:$0xff] }
 0x14c   :  { %2403 = vmatprep.subr.bf16.mxu0 %v3143_v14  ;;  %2425 = vmatprep.subr.bf16.mxu1 %v3146_v15  ;;  %v114_v15 = vld [vmem:[#allocation7 + $0x80] sm:$0xff] }
 0x14d   :  { %v118_v14 = vld [vmem:[#allocation7 + $0xa0] sm:$0xff] }
 0x14f   :  { %2404 = vmatpush3.bf16.msra.mxu0 %v3149_v10  ;;  %2426 = vmatpush3.bf16.msra.mxu1 %v3153_v18  ;;  %v3166_v10 = vcombine.high %v99_v21, %v103_v25  ;;  %v111_v18 = vld [vmem:[#allocation7 + $0x68] sm:$0xff]  ;;  %v3181_v25 = vcombine.high %v114_v15, %v118_v14 }
 0x150   :  { %1477 = vmatprep.subr.bf16.mxu0 %v3162_v24  ;;  %v3184_v24 = vcombine.high %v115_v13, %v119_v19 }
 0x151   :  { %3658 = vst [vmem:[#allocation34_spill] sm:$0xff] %v3166_v10  ;;  %1520 = vmatprep.subr.bf16.mxu1 %v3166_v10  ;;  %3663 = vst [vmem:[#allocation39_spill] sm:$0xff] %v3181_v25  ;;  %v127_v10 = vld [vmem:[#allocation7 + $0xe8] sm:$0xff] }
 0x152   :  { %1107 = vmatmul.mubr.bf16.vlgmr.msra.gmra.mrb[12].mxu0 %v597_v26  ;;  %1148 = vmatmul.mubr.bf16.vlgmr.msra.gmra.mrb[12].mxu1 %v599_v30  ;;  %v3168_v26 = vcombine.high %v106_v27, %v110_v29  ;;  %v107_v30 = vld [vmem:[#allocation7 + $0x48] sm:$0xff]  ;;  %3664 = vst [vmem:[#allocation40_spill] sm:$0xff] %v3184_v24  ;;  %v3187_v27 = vcombine.low %v114_v15, %v118_v14 }
 0x153   :  { %1509 = vmatprep.mubr.bf16.mxu0 %v3573_v0  ;;  %1552 = vmatprep.mubr.bf16.mxu1 %v3573_v0  ;;  %v3171_v0 = vcombine.high %v107_v30, %v111_v18  ;;  %v3179_v21 = vcombine.low %v107_v30, %v111_v18  ;;  %v3191_v18 = vcombine.low %v115_v13, %v119_v19 }
 0x154   :  { %3659 = vst [vmem:[#allocation35_spill] sm:$0xff] %v3168_v26  ;;  %1478 = vmatpush1.bf16.msra.mxu0 %v3160_v23  ;;  %1521 = vmatpush1.bf16.msra.mxu1 %v3164_v33  ;;  %3665 = vst [vmem:[#allocation41_spill] sm:$0xff] %v3187_v27  ;;  %v3193_v29 = vcombine.high %v122_v11, %v126_v9  ;;  %v3196_v30 = vcombine.high %v123_v8, %v127_v10  ;;  %v131_v33 = vld [vmem:[#allocation7 + $0x108] sm:$0xff] }
 0x155   :  { %3660 = vst [vmem:[#allocation36_spill] sm:$0xff] %v3171_v0  ;;  %1479 = vmatprep.subr.bf16.mxu0 %v3168_v26  ;;  %3662 = vst [vmem:[#allocation38_spill] sm:$0xff] %v3179_v21  ;;  %1522 = vmatprep.subr.bf16.mxu1 %v3171_v0  ;;  %v130_v0 = vld [vmem:[#allocation7 + $0x100] sm:$0xff]  ;;  %v135_v23 = vld [vmem:[#allocation7 + $0x128] sm:$0xff]  ;;  %v3199_v14 = vcombine.low %v122_v11, %v126_v9  ;;  %v3203_v13 = vcombine.low %v123_v8, %v127_v10 }
 0x156   :  { %3666 = vst [vmem:[#allocation42_spill] sm:$0xff] %v3191_v18  ;;  %3667 = vst [vmem:[#allocation43_spill] sm:$0xff] %v3193_v29  ;;  %v134_v26 = vld [vmem:[#allocation7 + $0x120] sm:$0xff]  ;;  %v3208_v19 = vcombine.high %v131_v33, %v135_v23  ;;  %v3215_v8 = vcombine.low %v131_v33, %v135_v23 }
 0x157   :  { %3668 = vst [vmem:[#allocation44_spill] sm:$0xff] %v3196_v30  ;;  %3669 = vst [vmem:[#allocation45_spill] sm:$0xff] %v3199_v14  ;;  %v3205_v15 = vcombine.high %v130_v0, %v134_v26  ;;  %v3211_v9 = vcombine.low %v130_v0, %v134_v26  ;;  %v146_v23 = vld [vmem:[#allocation7 + $0x180] sm:$0xff]  ;;  %v147_v26 = vld [vmem:[#allocation7 + $0x188] sm:$0xff] }
 0x158   :  { %1480 = vmatpush1.bf16.msra.mxu0 %v3175_v20  ;;  %1523 = vmatpush1.bf16.msra.mxu1 %v3179_v21  ;;  %3670 = vst [vmem:[#allocation46_spill] sm:$0xff] %v3203_v13  ;;  %3672 = vst [vmem:[#allocation48_spill] sm:$0xff] %v3208_v19  ;;  %v139_v21 = vld [vmem:[#allocation7 + $0x148] sm:$0xff]  ;;  %v150_v33 = vld [vmem:[#allocation7 + $0x1a0] sm:$0xff] }
 0x159   :  { %1481 = vmatprep.subr.bf16.mxu0 %v3181_v25  ;;  %1524 = vmatprep.subr.bf16.mxu1 %v3184_v24  ;;  %3671 = vst [vmem:[#allocation47_spill] sm:$0xff] %v3205_v15  ;;  %v138_v24 = vld [vmem:[#allocation7 + $0x140] sm:$0xff]  ;;  %v143_v20 = vld [vmem:[#allocation7 + $0x168] sm:$0xff]  ;;  %3673 = vst [vmem:[#allocation49_spill] sm:$0xff] %v3211_v9 }
 0x15a   :  { %v142_v25 = vld [vmem:[#allocation7 + $0x160] sm:$0xff]  ;;  %3674 = vst [vmem:[#allocation50_spill] sm:$0xff] %v3215_v8  ;;  %v3220_v10 = vcombine.high %v139_v21, %v143_v20  ;;  %v3227_v0 = vcombine.low %v139_v21, %v143_v20 }
 0x15b   :  { %v3217_v11 = vcombine.high %v138_v24, %v142_v25  ;;  %v154_v20 = vld [vmem:[#allocation7 + $0x1c0] sm:$0xff] }
 0x15c   :  { %1482 = vmatpush1.bf16.msra.mxu0 %v3187_v27  ;;  %1525 = vmatpush1.bf16.msra.mxu1 %v3191_v18  ;;  %3676 = vst [vmem:[#allocation52_spill] sm:$0xff] %v3220_v10  ;;  %3678 = vst [vmem:[#allocation54_spill] sm:$0xff] %v3227_v0  ;;  %v158_v21 = vld [vmem:[#allocation7 + $0x1e0] sm:$0xff] }
 0x15d   :  { %1483 = vmatprep.subr.bf16.mxu0 %v3193_v29  ;;  %1526 = vmatprep.subr.bf16.mxu1 %v3196_v30  ;;  %3675 = vst [vmem:[#allocation51_spill] sm:$0xff] %v3217_v11  ;;  %v3223_v30 = vcombine.low %v138_v24, %v142_v25  ;;  %v3234_v24 = vcombine.low %v146_v23, %v150_v33 }
 0x15f   :  { %3677 = vst [vmem:[#allocation53_spill] sm:$0xff] %v3223_v30  ;;  %3680 = vst [vmem:[#allocation56_spill] sm:$0xff] %v3234_v24 }
 0x160   :  { %1484 = vmatpush1.bf16.msra.mxu0 %v3199_v14  ;;  %1527 = vmatpush1.bf16.msra.mxu1 %v3203_v13 }
 0x161   :  { %1485 = vmatprep.subr.bf16.mxu0 %v3205_v15  ;;  %1528 = vmatprep.subr.bf16.mxu1 %v3208_v19  ;;  %v3232_v19 = vcombine.high %v146_v23, %v150_v33  ;;  %v3246_v23 = vcombine.low %v154_v20, %v158_v21 }
 0x163   :  { %3679 = vst [vmem:[#allocation55_spill] sm:$0xff] %v3232_v19  ;;  %3684 = vst [vmem:[#allocation60_spill] sm:$0xff] %v3246_v23 }
 0x164   :  { %1486 = vmatpush1.bf16.msra.mxu0 %v3211_v9  ;;  %1529 = vmatpush1.bf16.msra.mxu1 %v3215_v8  ;;  %v151_v9 = vld [vmem:[#allocation7 + $0x1a8] sm:$0xff] }
 0x165   :  { %1487 = vmatprep.subr.bf16.mxu0 %v3217_v11  ;;  %1530 = vmatprep.subr.bf16.mxu1 %v3220_v10  ;;  %v3236_v25 = vcombine.low %v147_v26, %v151_v9  ;;  %v3238_v8 = vcombine.high %v147_v26, %v151_v9  ;;  %v159_v10 = vld [vmem:[#allocation7 + $0x1e8] sm:$0xff]  ;;  %v100_v26 = vld [vmem:[#allocation7 + $0x10] sm:$0xff] }
 0x167   :  { %3681 = vst [vmem:[#allocation57_spill] sm:$0xff] %v3236_v25  ;;  %3682 = vst [vmem:[#allocation58_spill] sm:$0xff] %v3238_v8 }
 0x168   :  { %1488 = vmatpush1.bf16.msra.mxu0 %v3223_v30  ;;  %1531 = vmatpush1.bf16.msra.mxu1 %v3227_v0  ;;  %v155_v0 = vld [vmem:[#allocation7 + $0x1c8] sm:$0xff]  ;;  %v3244_v30 = vcombine.high %v154_v20, %v158_v21  ;;  %v105_v20 = vld [vmem:[#allocation7 + $0x38] sm:$0xff] }
 0x169   :  { %1489 = vmatprep.subr.bf16.mxu0 %v3232_v19  ;;  %1532 = vmatprep.subr.bf16.mxu1 %v3238_v8  ;;  %v3248_v33 = vcombine.low %v155_v0, %v159_v10  ;;  %v3250_v9 = vcombine.high %v155_v0, %v159_v10  ;;  %v101_v8 = vld [vmem:[#allocation7 + $0x18] sm:$0xff] }
 0x16a   :  { %3683 = vst [vmem:[#allocation59_spill] sm:$0xff] %v3244_v30  ;;  %v3260_v21 = vcombine.low %v101_v8, %v105_v20  ;;  %v3262_v10 = vcombine.high %v101_v8, %v105_v20 }
 0x16b   :  { %3685 = vst [vmem:[#allocation61_spill] sm:$0xff] %v3248_v33  ;;  %3686 = vst [vmem:[#allocation62_spill] sm:$0xff] %v3250_v9 }
 0x16c   :  { %1490 = vmatpush1.bf16.msra.mxu0 %v3234_v24  ;;  %1533 = vmatpush1.bf16.msra.mxu1 %v3236_v25  ;;  %v104_v24 = vld [vmem:[#allocation7 + $0x30] sm:$0xff]  ;;  %3688 = vst [vmem:[#allocation64_spill] sm:$0xff] %v3262_v10 }
 0x16d   :  { %1491 = vmatprep.subr.bf16.mxu0 %v3244_v30  ;;  %1534 = vmatprep.subr.bf16.mxu1 %v3250_v9  ;;  %v3256_v25 = vcombine.low %v100_v26, %v104_v24  ;;  %v3258_v19 = vcombine.high %v100_v26, %v104_v24  ;;  %v2216_v9 = vld [vmem:[%s3568_s5] ss:$0 sm:$0xff]  ;;  %s2877_s5 = smov [#allocation10]  }
 0x16e   :  { %s2181_s21 = sshll.u32 %s2877_s5, 4  ;;  %s2182_s21 = int_to_ptr.vmem [resolvable:$true] %s2181_s21 }
 0x16f   :  { %3687 = vst [vmem:[#allocation63_spill] sm:$0xff] %v3258_v19  ;;  %s2838_s24 = scalar_lea.vmem %s2182_s21, 256  ;;  %p2843_p5 = scmp.lt.s32.totalorder %s2182_s21, %s2182_s21 }
 0x170   :  { %1492 = vmatpush1.bf16.msra.mxu0 %v3246_v23  ;;  %1535 = vmatpush1.bf16.msra.mxu1 %v3248_v33  ;;  %p2839_p4 = scmp.ne.s32.totalorder %s2182_s21, %s2838_s24  ;;  %p2844_p6 = scmp.lt.s32.totalorder %s2838_s24, %s2838_s24 }
 0x171   :  { %1563 = vmatprep.subr.bf16.mxu0 %v3258_v19  ;;  %1606 = vmatprep.subr.bf16.mxu1 %v3262_v10 }
 0x172   :  { %p2845_p7 = por %p2844_p6, %p2843_p5 }
 0x174   :  { %p2846_p8 = pnand %p2845_p7, %p2839_p4 }
 0x205   :  { %v2361_v0 = vpop.f32.mrb[8].mxu0  ;;  %v2383_v23 = vpop.f32.mrb[8].mxu1 }
 0x206   :  { %v2362_v33 = vpop.f32.mrb[9].mxu0  ;;  %v2384_v11 = vpop.f32.mrb[9].mxu1 }
 0x207   :  { %v2363_v30 = vadd.f32 %v2362_v33, %v2361_v0  ;;  %v2364_v24 = vpop.f32.mrb[10].mxu0  ;;  %v2385_v26 = vadd.f32 %v2384_v11, %v2383_v23  ;;  %v2386_v15 = vpop.f32.mrb[10].mxu1 }
 0x208   :  { %v2365_v13 = vpop.f32.mrb[11].mxu0  ;;  %v2387_v20 = vpop.f32.mrb[11].mxu1 }
 0x209   :  { %v1027_v14 = vadd.f32 %v2363_v30, %v2216_v9  ;;  %v2366_v8 = vadd.f32 %v2365_v13, %v2364_v24  ;;  %v2388_v29 = vadd.f32 %v2387_v20, %v2386_v15  ;;  %v108_v15 = vld [vmem:[#allocation7 + $0x50] sm:$0xff]  ;;  %v129_v20 = vld [vmem:[#allocation7 + $0xf8] sm:$0xff] }
 0x20a   :  { %v124_v24 = vld [vmem:[#allocation7 + $0xd0] sm:$0xff] }
 0x20b   :  { %v1068_v19 = vadd.f32 %v2385_v26, %v1027_v14  ;;  %v1030_v18 = vadd.f32 %v2366_v8, %v2216_v9  ;;  %v112_v14 = vld [vmem:[#allocation7 + $0x70] sm:$0xff]  ;;  %v109_v9 = vld [vmem:[#allocation7 + $0x58] sm:$0xff] }
 0x20c   :  { %v128_v26 = vld [vmem:[#allocation7 + $0xf0] sm:$0xff]  ;;  %v125_v8 = vld [vmem:[#allocation7 + $0xd8] sm:$0xff] }
 0x20d   :  { %v1071_v10 = vadd.f32 %v2388_v29, %v1030_v18  ;;  %v113_v18 = vld [vmem:[#allocation7 + $0x78] sm:$0xff] }
 0x225   :  { %v2405_v27 = vpop.f32.mrb[12].mxu0  ;;  %v2427_v7 = vpop.f32.mrb[12].mxu1 }
 0x226   :  { %v2406_v5 = vpop.f32.mrb[13].mxu0  ;;  %v2428_v42 = vpop.f32.mrb[13].mxu1 }
 0x227   :  { %v2407_v43 = vadd.f32 %v2406_v5, %v2405_v27  ;;  %v2408_v41 = vpop.f32.mrb[14].mxu0  ;;  %v2429_v39 = vadd.f32 %v2428_v42, %v2427_v7  ;;  %v2430_v33 = vpop.f32.mrb[14].mxu1  ;;  %v3277_v42 = vcombine.high %v108_v15, %v112_v14  ;;  %v3279_v7 = vcombine.high %v109_v9, %v113_v18  ;;  %v117_v27 = vld [vmem:[#allocation7 + $0x98] sm:$0xff] }
 0x228   :  { %v2409_v0 = vpop.f32.mrb[15].mxu0  ;;  %v2431_v23 = vpop.f32.mrb[15].mxu1 }
 0x229   :  { %v1109_v38 = vadd.f32 %v2407_v43, %v1068_v19  ;;  %v2410_v11 = vadd.f32 %v2409_v0, %v2408_v41  ;;  %v2432_v37 = vadd.f32 %v2431_v23, %v2430_v33  ;;  %v116_v41 = vld [vmem:[#allocation7 + $0x90] sm:$0xff]  ;;  %v3693_v33 = vmov 0  }
 0x22a   :  { %v120_v43 = vld [vmem:[#allocation7 + $0xb0] sm:$0xff]  ;;  %v3305_v23 = vcombine.high %v124_v24, %v128_v26 }
 0x22b   :  { %v3269_v30 = vadd.f32 %v2429_v39, %v1109_v38  ;;  %v1112_v13 = vadd.f32 %v2410_v11, %v1071_v10  ;;  %v121_v38 = vld [vmem:[#allocation7 + $0xb8] sm:$0xff]  ;;  %v3287_v39 = vcombine.low %v109_v9, %v113_v18  ;;  %v3291_v19 = vcombine.high %v116_v41, %v120_v43 }
 0x22c   :  { %v3293_v10 = vcombine.high %v117_v27, %v121_v38  ;;  %v3299_v0 = vcombine.low %v116_v41, %v120_v43  ;;  %v3301_v11 = vcombine.low %v117_v27, %v121_v38  ;;  %3696 = vst [vmem:[#allocation71_spill] sm:$0xff] %v3305_v23  ;;  %v133_v9 = vld [vmem:[#allocation7 + $0x118] sm:$0xff]  ;;  %v3311_v41 = vcombine.low %v124_v24, %v128_v26 }
 0x22d   :  { %v3271_v29 = vadd.f32 %v2432_v37, %v1112_v13  ;;  %v3285_v37 = vcombine.low %v108_v15, %v112_v14  ;;  %3690 = vst [vmem:[#allocation66_spill] sm:$0xff] %v3287_v39  ;;  %3691 = vst [vmem:[#allocation67_spill] sm:$0xff] %v3291_v19  ;;  %v3307_v13 = vcombine.high %v125_v8, %v129_v20  ;;  %v132_v15 = vld [vmem:[#allocation7 + $0x110] sm:$0xff]  ;;  %v137_v18 = vld [vmem:[#allocation7 + $0x138] sm:$0xff] }
 0x22e   :  { %3692 = vst [vmem:[#allocation68_spill] sm:$0xff] %v3293_v10  ;;  %3694 = vst [vmem:[#allocation69_spill] sm:$0xff] %v3299_v0  ;;  %v136_v14 = vld [vmem:[#allocation7 + $0x130] sm:$0xff]  ;;  %v3313_v43 = vcombine.low %v125_v8, %v129_v20  ;;  %v3319_v38 = vcombine.high %v133_v9, %v137_v18  ;;  %v3325_v26 = vcombine.low %v133_v9, %v137_v18 }
 0x22f   :  { %v3275_v5 = vpack.c.bf16 %v3271_v29, %v3269_v30  ;;  %3689 = vst [vmem:[#allocation65_spill] sm:$0xff] %v3285_v37  ;;  %3695 = vst [vmem:[#allocation70_spill] sm:$0xff] %v3301_v11  ;;  %v3317_v27 = vcombine.high %v132_v15, %v136_v14  ;;  %v3323_v24 = vcombine.low %v132_v15, %v136_v14 }
 0x230   :  { %3697 = vst [vmem:[#allocation72_spill] sm:$0xff] %v3307_v13  ;;  %3698 = vst [vmem:[#allocation73_spill] sm:$0xff] %v3311_v41 }
 0x231   :  { %1510 = vmatmul.mubr.bf16.vlgmr.msra.gmra.mrb[16].mxu0 %v3275_v5  ;;  %1553 = vmatmul.mubr.bf16.vlgmr.msra.gmra.mrb[16].mxu1 %v3275_v5  ;;  %3699 = vst [vmem:[#allocation74_spill] sm:$0xff] %v3313_v43  ;;  %3700 = vst [vmem:[#allocation75_spill] sm:$0xff] %v3317_v27 }
 0x232   :  { %1564 = vmatpush1.bf16.msra.mxu0 %v3256_v25  ;;  %1607 = vmatpush1.bf16.msra.mxu1 %v3260_v21  ;;  %3701 = vst [vmem:[#allocation76_spill] sm:$0xff] %v3319_v38 }
 0x233   :  { %1565 = vmatprep.subr.bf16.mxu0 %v3277_v42  ;;  %1608 = vmatprep.subr.bf16.mxu1 %v3279_v7 }
 0x234   :  { %1595 = vmatprep.mubr.bf16.mxu0 %v3693_v33  ;;  %1638 = vmatprep.mubr.bf16.mxu1 %v3693_v33 }
 0x236   :  { %1566 = vmatpush1.bf16.msra.mxu0 %v3285_v37  ;;  %1609 = vmatpush1.bf16.msra.mxu1 %v3287_v39  ;;  %v141_v39 = vld [vmem:[#allocation7 + $0x158] sm:$0xff] }
 0x237   :  { %1567 = vmatprep.subr.bf16.mxu0 %v3291_v19  ;;  %1610 = vmatprep.subr.bf16.mxu1 %v3293_v10  ;;  %v140_v10 = vld [vmem:[#allocation7 + $0x150] sm:$0xff]  ;;  %v145_v37 = vld [vmem:[#allocation7 + $0x178] sm:$0xff] }
 0x238   :  { %v144_v19 = vld [vmem:[#allocation7 + $0x170] sm:$0xff]  ;;  %v3331_v20 = vcombine.high %v141_v39, %v145_v37  ;;  %v3337_v14 = vcombine.low %v141_v39, %v145_v37 }
 0x239   :  { %v3329_v8 = vcombine.high %v140_v10, %v144_v19  ;;  %v3335_v15 = vcombine.low %v140_v10, %v144_v19 }
 0x23a   :  { %1568 = vmatpush1.bf16.msra.mxu0 %v3299_v0  ;;  %1611 = vmatpush1.bf16.msra.mxu1 %v3301_v11  ;;  %3702 = vst [vmem:[#allocation77_spill] sm:$0xff] %v3331_v20  ;;  %v149_v11 = vld [vmem:[#allocation7 + $0x198] sm:$0xff] }
 0x23b   :  { %1569 = vmatprep.subr.bf16.mxu0 %v3305_v23  ;;  %1612 = vmatprep.subr.bf16.mxu1 %v3307_v13  ;;  %v148_v13 = vld [vmem:[#allocation7 + $0x190] sm:$0xff]  ;;  %v153_v0 = vld [vmem:[#allocation7 + $0x1b8] sm:$0xff]  ;;  %3703 = vst [vmem:[#allocation78_spill] sm:$0xff] %v3335_v15 }
 0x23c   :  { %v152_v23 = vld [vmem:[#allocation7 + $0x1b0] sm:$0xff]  ;;  %v3343_v18 = vcombine.high %v149_v11, %v153_v0  ;;  %v3349_v37 = vcombine.low %v149_v11, %v153_v0  ;;  %v3367_v0 = vld [vmem:[#allocation8 + $0x40] sm:$0xff]  }
 0x23d   :  { %v3341_v9 = vcombine.high %v148_v13, %v152_v23  ;;  %v3347_v19 = vcombine.low %v148_v13, %v152_v23  ;;  %v3370_v11 = vld [vmem:[#allocation8 + $0xc0] sm:$0xff]  }
 0x23e   :  { %1570 = vmatpush1.bf16.msra.mxu0 %v3311_v41  ;;  %1613 = vmatpush1.bf16.msra.mxu1 %v3313_v43  ;;  %v157_v43 = vld [vmem:[#allocation7 + $0x1d8] sm:$0xff]  ;;  %v3375_v23 = vld [vmem:[#allocation8] sm:$0xff]  }
 0x23f   :  { %1571 = vmatprep.subr.bf16.mxu0 %v3317_v27  ;;  %1614 = vmatprep.subr.bf16.mxu1 %v3319_v38  ;;  %v156_v38 = vld [vmem:[#allocation7 + $0x1d0] sm:$0xff]  ;;  %v161_v41 = vld [vmem:[#allocation7 + $0x1f8] sm:$0xff]  ;;  %v3378_v13 = vld [vmem:[#allocation8 + $0x80] sm:$0xff]  }
 0x240   :  { %v160_v27 = vld [vmem:[#allocation7 + $0x1f0] sm:$0xff]  ;;  %v3355_v10 = vcombine.high %v157_v43, %v161_v41  ;;  %3704 = vst [vmem:[#allocation79_spill] sm:$0xff] %v3378_v13 }
 0x241   :  { %v3353_v39 = vcombine.high %v156_v38, %v160_v27 }
 0x242   :  { %1572 = vmatpush1.bf16.msra.mxu0 %v3323_v24  ;;  %1615 = vmatpush1.bf16.msra.mxu1 %v3325_v26 }
 0x243   :  { %1573 = vmatprep.subr.bf16.mxu0 %v3329_v8  ;;  %1616 = vmatprep.subr.bf16.mxu1 %v3331_v20  ;;  %v3359_v20 = vcombine.low %v156_v38, %v160_v27  ;;  %v3387_v27 = vld [vmem:[#allocation8 + $0x8] sm:$0xff]   ;;  %v3393_v38 = vld [vmem:[#allocation8 + $0x50] sm:$0xff]  }
 0x246   :  { %1574 = vmatpush1.bf16.msra.mxu0 %v3335_v15  ;;  %1617 = vmatpush1.bf16.msra.mxu1 %v3337_v14  ;;  %v3361_v15 = vcombine.low %v157_v43, %v161_v41  ;;  %v3381_v41 = vld [vmem:[#allocation8 + $0x48] sm:$0xff]  }
 0x247   :  { %1575 = vmatprep.subr.bf16.mxu0 %v3341_v9  ;;  %1618 = vmatprep.subr.bf16.mxu1 %v3343_v18  ;;  %3705 = vst [vmem:[#allocation80_spill] sm:$0xff] %v3381_v41  ;;  %v3384_v43 = vld [vmem:[#allocation8 + $0xc8] sm:$0xff]  }
 0x248   :  { %3706 = vst [vmem:[#allocation81_spill] sm:$0xff] %v3384_v43 }
 0x24a   :  { %1576 = vmatpush1.bf16.msra.mxu0 %v3347_v19  ;;  %1619 = vmatpush1.bf16.msra.mxu1 %v3349_v37 }
 0x24b   :  { %1577 = vmatprep.subr.bf16.mxu0 %v3353_v39  ;;  %1620 = vmatprep.subr.bf16.mxu1 %v3355_v10 }
 0x24e   :  { %1578 = vmatpush1.bf16.msra.mxu0 %v3359_v20  ;;  %1621 = vmatpush1.bf16.msra.mxu1 %v3361_v15 }
 0x24f   :  { %2433 = vmatprep.subr.bf16.mxu0 %v3367_v0  ;;  %2455 = vmatprep.subr.bf16.mxu1 %v3370_v11 }
 0x251   :  { %1596 = vmatmul.mubr.bf16.vlgmr.msra.gmra.mrb[20].mxu0 %v3275_v5  ;;  %1639 = vmatmul.mubr.bf16.vlgmr.msra.gmra.mrb[20].mxu1 %v3275_v5  ;;  %v3390_v5 = vld [vmem:[#allocation8 + $0x88] sm:$0xff]  }
 0x252   :  { %2434 = vmatpush3.bf16.msra.mxu0 %v3375_v23  ;;  %2456 = vmatpush3.bf16.msra.mxu1 %v3378_v13  ;;  %v3396_v13 = vld [vmem:[#allocation8 + $0xd0] sm:$0xff]  }
 0x253   :  { %2435 = vmatprep.subr.bf16.mxu0 %v3381_v41  ;;  %2457 = vmatprep.subr.bf16.mxu1 %v3384_v43  ;;  %v3399_v41 = vld [vmem:[#allocation8 + $0x10] sm:$0xff]  }
 0x254   :  { %v3402_v43 = vld [vmem:[#allocation8 + $0x90] sm:$0xff]  }
 0x256   :  { %2436 = vmatpush3.bf16.msra.mxu0 %v3387_v27  ;;  %2458 = vmatpush3.bf16.msra.mxu1 %v3390_v5 }
 0x257   :  { %2437 = vmatprep.subr.bf16.mxu0 %v3393_v38  ;;  %2459 = vmatprep.subr.bf16.mxu1 %v3396_v13 }
 0x25a   :  { %2438 = vmatpush3.bf16.msra.mxu0 %v3399_v41  ;;  %2460 = vmatpush3.bf16.msra.mxu1 %v3402_v43 }
 0x25b   :  { %2439 = vmatprep.subr.bf16.mxu0 %v2990_v46  ;;  %2461 = vmatprep.subr.bf16.mxu1 %v2992_v47 }
 0x25e   :  { %2440 = vmatpush3.bf16.msra.mxu0 %v2994_v48  ;;  %2462 = vmatpush3.bf16.msra.mxu1 %v2996_v49 }
 0x25f   :  { %2441 = vmatprep.subr.bf16.mxu0 %v2999_v50  ;;  %2463 = vmatprep.subr.bf16.mxu1 %v3002_v51 }
 0x262   :  { %2442 = vmatpush3.bf16.msra.mxu0 %v3004_v52  ;;  %2464 = vmatpush3.bf16.msra.mxu1 %v3006_v53 }
 0x263   :  { %2443 = vmatprep.subr.bf16.mxu0 %v3008_v54  ;;  %2465 = vmatprep.subr.bf16.mxu1 %v3011_v55 }
 0x266   :  { %2444 = vmatpush3.bf16.msra.mxu0 %v3016_v56  ;;  %2466 = vmatpush3.bf16.msra.mxu1 %v3018_v57 }
 0x267   :  { %2445 = vmatprep.subr.bf16.mxu0 %v3026_v58  ;;  %2467 = vmatprep.subr.bf16.mxu1 %v3028_v59  ;;  %v3707_v58 = vld [vmem:[#allocation15_spill] sm:$0xff]  ;;  %v3708_v59 = vld [vmem:[#allocation16_spill] sm:$0xff] }
 0x26a   :  { %2446 = vmatpush3.bf16.msra.mxu0 %v3030_v60  ;;  %2468 = vmatpush3.bf16.msra.mxu1 %v3032_v61  ;;  %v3709_v60 = vld [vmem:[#allocation17_spill] sm:$0xff]  ;;  %v3710_v61 = vld [vmem:[#allocation18_spill] sm:$0xff] }
 0x26b   :  { %2447 = vmatprep.subr.bf16.mxu0 %v3038_v62  ;;  %2469 = vmatprep.subr.bf16.mxu1 %v3040_v63  ;;  %v3711_v62 = vld [vmem:[#allocation19_spill] sm:$0xff]  ;;  %v3712_v63 = vld [vmem:[#allocation20_spill] sm:$0xff] }
 0x26e   :  { %2448 = vmatpush3.bf16.msra.mxu0 %v3042_v1  ;;  %2470 = vmatpush3.bf16.msra.mxu1 %v3044_v2  ;;  %v3713_v1 = vld [vmem:[#allocation21_spill] sm:$0xff]  ;;  %v3714_v2 = vld [vmem:[#allocation22_spill] sm:$0xff] }
 0x26f   :  { %2477 = vmatprep.subr.bf16.mxu0 %v3050_v3  ;;  %2499 = vmatprep.subr.bf16.mxu1 %v3052_v4  ;;  %v3715_v3 = vld [vmem:[#allocation23_spill] sm:$0xff]  ;;  %v3716_v4 = vld [vmem:[#allocation24_spill] sm:$0xff] }
 0x304   :  { %v1511_v46 = vpop.f32.mrb[16].mxu0  ;;  %v1554_v47 = vpop.f32.mrb[16].mxu1 }
 0x305   :  { %v1513_v48 = vpop.f32.mrb[17].mxu0  ;;  %v1556_v49 = vpop.f32.mrb[17].mxu1 }
 0x306   :  { %v1515_v50 = vpop.f32.mrb[18].mxu0  ;;  %v1558_v51 = vpop.f32.mrb[18].mxu1 }
 0x307   :  { %v1651_v52 = vpack.c.bf16 %v1515_v50, %v1511_v46  ;;  %v1653_v53 = vpack.c.bf16 %v1558_v51, %v1554_v47  ;;  %v1517_v54 = vpop.f32.mrb[19].mxu0  ;;  %v1560_v55 = vpop.f32.mrb[19].mxu1  ;;  %v3723_v50 = vld [vmem:[#allocation32_spill] sm:$0xff]  ;;  %v3724_v51 = vld [vmem:[#allocation34_spill] sm:$0xff] }
 0x308   :  { %v1652_v56 = vpack.c.bf16 %v1517_v54, %v1513_v48  ;;  %v1654_v57 = vpack.c.bf16 %v1560_v55, %v1556_v49  ;;  %v3721_v48 = vld [vmem:[#allocation29_spill] sm:$0xff]  ;;  %v3722_v49 = vld [vmem:[#allocation30_spill] sm:$0xff]  ;;  %v3727_v54 = vld [vmem:[#allocation35_spill] sm:$0xff] }
 0x309   :  { %v3728_v55 = vld [vmem:[#allocation36_spill] sm:$0xff] }
 0x30a   :  { %1691 = vmatprep.mubr.bf16.mxu0 %v1652_v56  ;;  %1732 = vmatprep.mubr.bf16.mxu1 %v1654_v57  ;;  %v3729_v56 = vld [vmem:[#allocation37_spill] sm:$0xff]  ;;  %v3730_v57 = vld [vmem:[#allocation38_spill] sm:$0xff] }
 0x30b   :  { %1692 = vmatmul.mubr.bf16.vlgmr.msra.gmra.mrb[24].mxu0 %v1651_v52  ;;  %1733 = vmatmul.mubr.bf16.vlgmr.msra.gmra.mrb[24].mxu1 %v1653_v53  ;;  %v3725_v52 = vld [vmem:[#allocation31_spill] sm:$0xff]  ;;  %v3726_v53 = vld [vmem:[#allocation33_spill] sm:$0xff] }
 0x30c   :  { %2478 = vmatpush3.bf16.msra.mxu0 %v3059_v40  ;;  %2500 = vmatpush3.bf16.msra.mxu1 %v3061_v44 }
 0x30d   :  { %2479 = vmatprep.subr.bf16.mxu0 %v3063_v45  ;;  %2501 = vmatprep.subr.bf16.mxu1 %v3065_v6  ;;  %v3717_v45 = vld [vmem:[#allocation25_spill] sm:$0xff]  ;;  %v3718_v6 = vld [vmem:[#allocation26_spill] sm:$0xff] }
 0x310   :  { %2480 = vmatpush3.bf16.msra.mxu0 %v3070_v12  ;;  %2502 = vmatpush3.bf16.msra.mxu1 %v3076_v16 }
 0x311   :  { %2481 = vmatprep.subr.bf16.mxu0 %v3078_v17  ;;  %2503 = vmatprep.subr.bf16.mxu1 %v3083_v22  ;;  %v3719_v17 = vld [vmem:[#allocation27_spill] sm:$0xff]  ;;  %v3720_v22 = vld [vmem:[#allocation28_spill] sm:$0xff] }
 0x314   :  { %2482 = vmatpush3.bf16.msra.mxu0 %v3088_v28  ;;  %2504 = vmatpush3.bf16.msra.mxu1 %v3093_v31 }
 0x315   :  { %2483 = vmatprep.subr.bf16.mxu0 %v3095_v32  ;;  %2505 = vmatprep.subr.bf16.mxu1 %v3098_v34 }
 0x318   :  { %2484 = vmatpush3.bf16.msra.mxu0 %v3101_v35  ;;  %2506 = vmatpush3.bf16.msra.mxu1 %v3105_v36 }
 0x319   :  { %2485 = vmatprep.subr.bf16.mxu0 %v3707_v58  ;;  %2507 = vmatprep.subr.bf16.mxu1 %v3708_v59  ;;  %v3731_v58 = vld [vmem:[#allocation39_spill] sm:$0xff]  ;;  %v3732_v59 = vld [vmem:[#allocation40_spill] sm:$0xff] }
 0x31c   :  { %2486 = vmatpush3.bf16.msra.mxu0 %v3709_v60  ;;  %2508 = vmatpush3.bf16.msra.mxu1 %v3710_v61  ;;  %v3733_v60 = vld [vmem:[#allocation41_spill] sm:$0xff]  ;;  %v3734_v61 = vld [vmem:[#allocation42_spill] sm:$0xff] }
 0x31d   :  { %2487 = vmatprep.subr.bf16.mxu0 %v3711_v62  ;;  %2509 = vmatprep.subr.bf16.mxu1 %v3712_v63  ;;  %v3735_v62 = vld [vmem:[#allocation43_spill] sm:$0xff]  ;;  %v3736_v63 = vld [vmem:[#allocation44_spill] sm:$0xff] }
 0x320   :  { %2488 = vmatpush3.bf16.msra.mxu0 %v3713_v1  ;;  %2510 = vmatpush3.bf16.msra.mxu1 %v3714_v2  ;;  %v3737_v1 = vld [vmem:[#allocation45_spill] sm:$0xff]  ;;  %v3738_v2 = vld [vmem:[#allocation46_spill] sm:$0xff] }
 0x321   :  { %2489 = vmatprep.subr.bf16.mxu0 %v3715_v3  ;;  %2511 = vmatprep.subr.bf16.mxu1 %v3716_v4  ;;  %v3739_v3 = vld [vmem:[#allocation47_spill] sm:$0xff]  ;;  %v3740_v4 = vld [vmem:[#allocation48_spill] sm:$0xff] }
 0x324   :  { %v1597_v40 = vpop.f32.mrb[20].mxu0  ;;  %v1640_v44 = vpop.f32.mrb[20].mxu1  ;;  %2490 = vmatpush3.bf16.msra.mxu0 %v3717_v45  ;;  %2512 = vmatpush3.bf16.msra.mxu1 %v3718_v6  ;;  %v3743_v45 = vld [vmem:[#allocation51_spill] sm:$0xff]  ;;  %v3744_v6 = vld [vmem:[#allocation52_spill] sm:$0xff] }
 0x325   :  { %v1599_v12 = vpop.f32.mrb[21].mxu0  ;;  %v1642_v16 = vpop.f32.mrb[21].mxu1  ;;  %2491 = vmatprep.subr.bf16.mxu0 %v3719_v17  ;;  %2513 = vmatprep.subr.bf16.mxu1 %v3720_v22  ;;  %v3747_v17 = vld [vmem:[#allocation55_spill] sm:$0xff]  ;;  %v3748_v22 = vld [vmem:[#allocation58_spill] sm:$0xff] }
 0x326   :  { %v1601_v28 = vpop.f32.mrb[22].mxu0  ;;  %v1644_v31 = vpop.f32.mrb[22].mxu1 }
 0x327   :  { %v1655_v32 = vpack.c.bf16 %v1601_v28, %v1597_v40  ;;  %v1657_v34 = vpack.c.bf16 %v1644_v31, %v1640_v44  ;;  %v1603_v35 = vpop.f32.mrb[23].mxu0  ;;  %v1646_v36 = vpop.f32.mrb[23].mxu1  ;;  %v3741_v40 = vld [vmem:[#allocation49_spill] sm:$0xff]  ;;  %v3742_v44 = vld [vmem:[#allocation50_spill] sm:$0xff]  ;;  %v3749_v28 = vld [vmem:[#allocation56_spill] sm:$0xff] }
 0x328   :  { %v1656_v46 = vpack.c.bf16 %v1603_v35, %v1599_v12  ;;  %v1658_v47 = vpack.c.bf16 %v1646_v36, %v1642_v16  ;;  %2492 = vmatpush3.bf16.msra.mxu0 %v3721_v48  ;;  %2514 = vmatpush3.bf16.msra.mxu1 %v3722_v49  ;;  %v3745_v12 = vld [vmem:[#allocation53_spill] sm:$0xff]  ;;  %v3746_v16 = vld [vmem:[#allocation54_spill] sm:$0xff]  ;;  %v3753_v35 = vld [vmem:[#allocation60_spill] sm:$0xff] }
 0x329   :  { %1826 = vmatprep.subr.bf16.mxu0 %v3723_v50  ;;  %1869 = vmatprep.subr.bf16.mxu1 %v3724_v51  ;;  %v3750_v31 = vld [vmem:[#allocation57_spill] sm:$0xff] }
 0x32a   :  { %1773 = vmatprep.mubr.bf16.mxu0 %v1656_v46  ;;  %1814 = vmatprep.mubr.bf16.mxu1 %v1658_v47  ;;  %v3754_v36 = vld [vmem:[#allocation61_spill] sm:$0xff]  ;;  %v3755_v46 = vld [vmem:[#allocation63_spill] sm:$0xff]  ;;  %v3756_v47 = vld [vmem:[#allocation64_spill] sm:$0xff] }
 0x32b   :  { %1774 = vmatmul.mubr.bf16.vlgmr.msra.gmra.mrb[28].mxu0 %v1655_v32  ;;  %1815 = vmatmul.mubr.bf16.vlgmr.msra.gmra.mrb[28].mxu1 %v1657_v34  ;;  %v3751_v32 = vld [vmem:[#allocation59_spill] sm:$0xff]  ;;  %v3752_v34 = vld [vmem:[#allocation62_spill] sm:$0xff] }
 0x32c   :  { %1827 = vmatpush1.bf16.msra.mxu0 %v3725_v52  ;;  %1870 = vmatpush1.bf16.msra.mxu1 %v3726_v53 }
 0x32d   :  { %1828 = vmatprep.subr.bf16.mxu0 %v3727_v54  ;;  %1871 = vmatprep.subr.bf16.mxu1 %v3728_v55 }
 0x32e   :  { %1858 = vmatprep.mubr.bf16.mxu0 %v3693_v33  ;;  %1901 = vmatprep.mubr.bf16.mxu1 %v3693_v33 }
 0x330   :  { %1829 = vmatpush1.bf16.msra.mxu0 %v3729_v56  ;;  %1872 = vmatpush1.bf16.msra.mxu1 %v3730_v57 }
 0x331   :  { %1830 = vmatprep.subr.bf16.mxu0 %v3731_v58  ;;  %1873 = vmatprep.subr.bf16.mxu1 %v3732_v59 }
 0x334   :  { %1831 = vmatpush1.bf16.msra.mxu0 %v3733_v60  ;;  %1874 = vmatpush1.bf16.msra.mxu1 %v3734_v61 }
 0x335   :  { %1832 = vmatprep.subr.bf16.mxu0 %v3735_v62  ;;  %1875 = vmatprep.subr.bf16.mxu1 %v3736_v63 }
 0x338   :  { %1833 = vmatpush1.bf16.msra.mxu0 %v3737_v1  ;;  %1876 = vmatpush1.bf16.msra.mxu1 %v3738_v2 }
 0x339   :  { %1834 = vmatprep.subr.bf16.mxu0 %v3739_v3  ;;  %1877 = vmatprep.subr.bf16.mxu1 %v3740_v4 }
 0x33c   :  { %1835 = vmatpush1.bf16.msra.mxu0 %v3741_v40  ;;  %1878 = vmatpush1.bf16.msra.mxu1 %v3742_v44 }
 0x33d   :  { %1836 = vmatprep.subr.bf16.mxu0 %v3743_v45  ;;  %1879 = vmatprep.subr.bf16.mxu1 %v3744_v6 }
 0x340   :  { %1837 = vmatpush1.bf16.msra.mxu0 %v3745_v12  ;;  %1880 = vmatpush1.bf16.msra.mxu1 %v3746_v16 }
 0x341   :  { %1838 = vmatprep.subr.bf16.mxu0 %v3747_v17  ;;  %1881 = vmatprep.subr.bf16.mxu1 %v3748_v22 }
 0x344   :  { %1839 = vmatpush1.bf16.msra.mxu0 %v3749_v28  ;;  %1882 = vmatpush1.bf16.msra.mxu1 %v3750_v31  ;;  %v1649_v31 = vadd.f32 %v3269_v30, %v3269_v30 }
 0x345   :  { %1840 = vmatprep.subr.bf16.mxu0 %v3751_v32  ;;  %1883 = vmatprep.subr.bf16.mxu1 %v3752_v34  ;;  %v1650_v32 = vadd.f32 %v3271_v29, %v3271_v29 }
 0x348   :  { %1841 = vmatpush1.bf16.msra.mxu0 %v3753_v35  ;;  %1884 = vmatpush1.bf16.msra.mxu1 %v3754_v36 }
 0x349   :  { %1912 = vmatprep.subr.bf16.mxu0 %v3755_v46  ;;  %1955 = vmatprep.subr.bf16.mxu1 %v3756_v47  ;;  %v3757_v47 = vld [vmem:[#allocation65_spill] sm:$0xff] }
 0x3de   :  { %v2449_v48 = vpop.f32.mrb[24].mxu0  ;;  %v2471_v49 = vpop.f32.mrb[24].mxu1 }
 0x3df   :  { %v2450_v50 = vpop.f32.mrb[25].mxu0  ;;  %v2472_v51 = vpop.f32.mrb[25].mxu1 }
 0x3e0   :  { %v2451_v52 = vadd.f32 %v2450_v50, %v2449_v48  ;;  %v2473_v53 = vadd.f32 %v2472_v51, %v2471_v49  ;;  %v2452_v54 = vpop.f32.mrb[26].mxu0  ;;  %v2474_v55 = vpop.f32.mrb[26].mxu1  ;;  %v3758_v48 = vld [vmem:[#allocation66_spill] sm:$0xff]  ;;  %v3759_v49 = vld [vmem:[#allocation67_spill] sm:$0xff]  ;;  %v3760_v50 = vld [vmem:[#allocation68_spill] sm:$0xff] }
 0x3e1   :  { %v2453_v56 = vpop.f32.mrb[27].mxu0  ;;  %v2475_v57 = vpop.f32.mrb[27].mxu1  ;;  %v3761_v51 = vld [vmem:[#allocation69_spill] sm:$0xff] }
 0x3e2   :  { %v1735_v58 = vadd.f32 %v2473_v53, %v2451_v52  ;;  %v2454_v59 = vadd.f32 %v2453_v56, %v2452_v54  ;;  %v2476_v60 = vadd.f32 %v2475_v57, %v2474_v55  ;;  %v3766_v52 = vld [vmem:[#allocation74_spill] sm:$0xff]  ;;  %v3768_v53 = vld [vmem:[#allocation76_spill] sm:$0xff]  ;;  %v3769_v54 = vld [vmem:[#allocation77_spill] sm:$0xff] }
 0x3e3   :  { %v3770_v55 = vld [vmem:[#allocation78_spill] sm:$0xff]  ;;  %v2716_v56 = vld [vmem:[#allocation8 + $0x38] sm:$0xff]  }
 0x3e4   :  { %v1738_v61 = vadd.f32 %v2476_v60, %v2454_v59  ;;  %v2717_v57 = vld [vmem:[#allocation8 + $0xb8] sm:$0xff]   ;;  %v2719_v59 = vld [vmem:[#allocation8 + $0x1c0] sm:$0xff]  }
 0x3fe   :  { %v2493_v62 = vpop.f32.mrb[28].mxu0  ;;  %v2515_v63 = vpop.f32.mrb[28].mxu1 }
 0x3ff   :  { %v2494_v1 = vpop.f32.mrb[29].mxu0  ;;  %v2516_v2 = vpop.f32.mrb[29].mxu1 }
 0x400   :  { %v2495_v3 = vadd.f32 %v2494_v1, %v2493_v62  ;;  %v2517_v4 = vadd.f32 %v2516_v2, %v2515_v63  ;;  %v2496_v40 = vpop.f32.mrb[30].mxu0  ;;  %v2518_v44 = vpop.f32.mrb[30].mxu1 }
 0x401   :  { %v2497_v45 = vpop.f32.mrb[31].mxu0  ;;  %v2519_v6 = vpop.f32.mrb[31].mxu1 }
 0x402   :  { %v1776_v12 = vadd.f32 %v2495_v3, %v1735_v58  ;;  %v2498_v16 = vadd.f32 %v2497_v45, %v2496_v40  ;;  %v2520_v17 = vadd.f32 %v2519_v6, %v2518_v44  ;;  %v2718_v58 = vld [vmem:[#allocation8 + $0x140] sm:$0xff]  }
 0x404   :  { %v1817_v22 = vadd.f32 %v2517_v4, %v1776_v12  ;;  %v1779_v28 = vadd.f32 %v2498_v16, %v1738_v61  ;;  %v2720_v12 = vld [vmem:[#allocation8 + $0x100] sm:$0xff]  }
 0x405   :  { %v2721_v16 = vld [vmem:[#allocation8 + $0x180] sm:$0xff]  }
 0x406   :  { %v1820_v34 = vadd.f32 %v2520_v17, %v1779_v28  ;;  %v3497_v35 = vadd.f32 %v1817_v22, %v1649_v31  ;;  %v2722_v17 = vld [vmem:[#allocation8 + $0x148] sm:$0xff]  }
 0x407   :  { %v2723_v22 = vld [vmem:[#allocation8 + $0x1c8] sm:$0xff]  }
 0x408   :  { %v3499_v36 = vadd.f32 %v1820_v34, %v1650_v32  ;;  %v2724_v28 = vld [vmem:[#allocation8 + $0x108] sm:$0xff]   ;;  %v2726_v32 = vld [vmem:[#allocation8 + $0x150] sm:$0xff]  }
 0x409   :  { %v2725_v31 = vld [vmem:[#allocation8 + $0x188] sm:$0xff]   ;;  %v2727_v34 = vld [vmem:[#allocation8 + $0x1d0] sm:$0xff]  }
 0x40a   :  { %v1825_v46 = vpack.c.bf16 %v3499_v36, %v3497_v35 }
 0x40c   :  { %1859 = vmatmul.mubr.bf16.vlgmr.msra.gmra.mrb[32].mxu0 %v1825_v46  ;;  %1902 = vmatmul.mubr.bf16.vlgmr.msra.gmra.mrb[32].mxu1 %v1825_v46 }
 0x40d   :  { %1913 = vmatpush1.bf16.msra.mxu0 %v3256_v25  ;;  %1956 = vmatpush1.bf16.msra.mxu1 %v3260_v21  ;;  %v3762_v25 = vld [vmem:[#allocation70_spill] sm:$0xff]  ;;  %v3763_v21 = vld [vmem:[#allocation71_spill] sm:$0xff] }
 0x40e   :  { %1914 = vmatprep.subr.bf16.mxu0 %v3277_v42  ;;  %1957 = vmatprep.subr.bf16.mxu1 %v3279_v7  ;;  %v3764_v42 = vld [vmem:[#allocation72_spill] sm:$0xff]  ;;  %v3765_v7 = vld [vmem:[#allocation73_spill] sm:$0xff] }
 0x40f   :  { %1944 = vmatprep.mubr.bf16.mxu0 %v3693_v33  ;;  %1987 = vmatprep.mubr.bf16.mxu1 %v3693_v33  ;;  %v3767_v33 = vld [vmem:[#allocation75_spill] sm:$0xff] }
 0x411   :  { %1915 = vmatpush1.bf16.msra.mxu0 %v3757_v47  ;;  %1958 = vmatpush1.bf16.msra.mxu1 %v3758_v48  ;;  %v2729_v47 = vld [vmem:[#allocation8 + $0x190] sm:$0xff]   ;;  %v2730_v48 = vld [vmem:[#allocation8 + $0x158] sm:$0xff]  }
 0x412   :  { %1916 = vmatprep.subr.bf16.mxu0 %v3759_v49  ;;  %1959 = vmatprep.subr.bf16.mxu1 %v3760_v50  ;;  %v2731_v49 = vld [vmem:[#allocation8 + $0x1d8] sm:$0xff]  }
 0x413   :  { %v2732_v50 = vld [vmem:[#allocation8 + $0x118] sm:$0xff]  }
 0x415   :  { %1917 = vmatpush1.bf16.msra.mxu0 %v3761_v51  ;;  %1960 = vmatpush1.bf16.msra.mxu1 %v3762_v25  ;;  %v2733_v51 = vld [vmem:[#allocation8 + $0x198] sm:$0xff]   ;;  %v2734_v25 = vld [vmem:[#allocation8 + $0x160] sm:$0xff]  }
 0x416   :  { %1918 = vmatprep.subr.bf16.mxu0 %v3763_v21  ;;  %1961 = vmatprep.subr.bf16.mxu1 %v3764_v42  ;;  %v2735_v21 = vld [vmem:[#allocation8 + $0x1e0] sm:$0xff]  }
 0x417   :  { %v2736_v42 = vld [vmem:[#allocation8 + $0x120] sm:$0xff]  }
 0x419   :  { %1919 = vmatpush1.bf16.msra.mxu0 %v3765_v7  ;;  %1962 = vmatpush1.bf16.msra.mxu1 %v3766_v52  ;;  %v2737_v7 = vld [vmem:[#allocation8 + $0x1a0] sm:$0xff]   ;;  %v2738_v52 = vld [vmem:[#allocation8 + $0x168] sm:$0xff]  }
 0x41a   :  { %1920 = vmatprep.subr.bf16.mxu0 %v3767_v33  ;;  %1963 = vmatprep.subr.bf16.mxu1 %v3768_v53  ;;  %v2739_v33 = vld [vmem:[#allocation8 + $0x1e8] sm:$0xff]  }
 0x41b   :  { %v2740_v53 = vld [vmem:[#allocation8 + $0x128] sm:$0xff]  }
 0x41d   :  { %1921 = vmatpush1.bf16.msra.mxu0 %v3323_v24  ;;  %1964 = vmatpush1.bf16.msra.mxu1 %v3325_v26  ;;  %v3771_v24 = vld [vmem:[#allocation79_spill] sm:$0xff]  ;;  %v3772_v26 = vld [vmem:[#allocation80_spill] sm:$0xff] }
 0x41e   :  { %1922 = vmatprep.subr.bf16.mxu0 %v3329_v8  ;;  %1965 = vmatprep.subr.bf16.mxu1 %v3769_v54  ;;  %v3773_v8 = vld [vmem:[#allocation81_spill] sm:$0xff]  ;;  %v2741_v54 = vld [vmem:[#allocation8 + $0x1a8] sm:$0xff]  }
 0x421   :  { %1923 = vmatpush1.bf16.msra.mxu0 %v3770_v55  ;;  %1966 = vmatpush1.bf16.msra.mxu1 %v3337_v14  ;;  %v2700_v14 = vld [vmem:[#allocation8 + $0x18] sm:$0xff]   ;;  %v2742_v55 = vld [vmem:[#allocation8 + $0x170] sm:$0xff]  }
 0x422   :  { %1924 = vmatprep.subr.bf16.mxu0 %v3341_v9  ;;  %1967 = vmatprep.subr.bf16.mxu1 %v3343_v18  ;;  %v2701_v9 = vld [vmem:[#allocation8 + $0x98] sm:$0xff]   ;;  %v2702_v18 = vld [vmem:[#allocation8 + $0x60] sm:$0xff]  }
 0x425   :  { %1925 = vmatpush1.bf16.msra.mxu0 %v3347_v19  ;;  %1968 = vmatpush1.bf16.msra.mxu1 %v3349_v37  ;;  %v2703_v19 = vld [vmem:[#allocation8 + $0xe0] sm:$0xff]  }
 0x426   :  { %1926 = vmatprep.subr.bf16.mxu0 %v3353_v39  ;;  %1969 = vmatprep.subr.bf16.mxu1 %v3355_v10  ;;  %v2704_v37 = vld [vmem:[#allocation8 + $0x20] sm:$0xff]   ;;  %v2706_v10 = vld [vmem:[#allocation8 + $0x68] sm:$0xff]  }
 0x427   :  { %v2705_v39 = vld [vmem:[#allocation8 + $0xa0] sm:$0xff]  }
 0x429   :  { %1927 = vmatpush1.bf16.msra.mxu0 %v3359_v20  ;;  %1970 = vmatpush1.bf16.msra.mxu1 %v3361_v15  ;;  %v2698_v20 = vld [vmem:[#allocation8 + $0x58] sm:$0xff]  }
 0x42a   :  { %2521 = vmatprep.subr.bf16.mxu0 %v3367_v0  ;;  %2543 = vmatprep.subr.bf16.mxu1 %v3370_v11  ;;  %v2699_v15 = vld [vmem:[#allocation8 + $0xd8] sm:$0xff]   ;;  %v2707_v0 = vld [vmem:[#allocation8 + $0xe8] sm:$0xff]  }
 0x42b   :  { %v2708_v11 = vld [vmem:[#allocation8 + $0x28] sm:$0xff]  }
 0x42c   :  { %1945 = vmatmul.mubr.bf16.vlgmr.msra.gmra.mrb[36].mxu0 %v1825_v46  ;;  %1988 = vmatmul.mubr.bf16.vlgmr.msra.gmra.mrb[36].mxu1 %v1825_v46  ;;  %v2728_v46 = vld [vmem:[#allocation8 + $0x110] sm:$0xff]  }
 0x42d   :  { %2522 = vmatpush3.bf16.msra.mxu0 %v3375_v23  ;;  %2544 = vmatpush3.bf16.msra.mxu1 %v3771_v24  ;;  %v2709_v23 = vld [vmem:[#allocation8 + $0xa8] sm:$0xff]   ;;  %v2743_v24 = vld [vmem:[#allocation8 + $0x1f0] sm:$0xff]  }
 0x42e   :  { %2523 = vmatprep.subr.bf16.mxu0 %v3772_v26  ;;  %2545 = vmatprep.subr.bf16.mxu1 %v3773_v8 }
 0x431   :  { %2524 = vmatpush3.bf16.msra.mxu0 %v3387_v27  ;;  %2546 = vmatpush3.bf16.msra.mxu1 %v3390_v5  ;;  %v2713_v27 = vld [vmem:[#allocation8 + $0xb0] sm:$0xff]   ;;  %v2714_v5 = vld [vmem:[#allocation8 + $0x78] sm:$0xff]  }
 0x432   :  { %2525 = vmatprep.subr.bf16.mxu0 %v3393_v38  ;;  %2547 = vmatprep.subr.bf16.mxu1 %v3396_v13  ;;  %v2710_v13 = vld [vmem:[#allocation8 + $0x70] sm:$0xff]   ;;  %v2715_v38 = vld [vmem:[#allocation8 + $0xf8] sm:$0xff]  }
 0x435   :  { %2526 = vmatpush3.bf16.msra.mxu0 %v3399_v41  ;;  %2548 = vmatpush3.bf16.msra.mxu1 %v3402_v43  ;;  %v2711_v41 = vld [vmem:[#allocation8 + $0xf0] sm:$0xff]  }
 0x436   :  { %2527 = vmatprep.subr.bf16.mxu0 %v2698_v20  ;;  %2549 = vmatprep.subr.bf16.mxu1 %v2699_v15  ;;  %v2712_v43 = vld [vmem:[#allocation8 + $0x30] sm:$0xff]  }
 0x437   :  { %v2744_v20 = vld [vmem:[#allocation8 + $0x130] sm:$0xff]  }
 0x438   :  { %v2745_v15 = vld [vmem:[#allocation8 + $0x1b0] sm:$0xff]  }
 0x439   :  { %2528 = vmatpush3.bf16.msra.mxu0 %v2700_v14  ;;  %2550 = vmatpush3.bf16.msra.mxu1 %v2701_v9 }
 0x43a   :  { %2529 = vmatprep.subr.bf16.mxu0 %v2702_v18  ;;  %2551 = vmatprep.subr.bf16.mxu1 %v2703_v19  ;;  %v2746_v18 = vld [vmem:[#allocation8 + $0x178] sm:$0xff]  }
 0x43b   :  { %v2747_v19 = vld [vmem:[#allocation8 + $0x1f8] sm:$0xff]  }
 0x43d   :  { %2530 = vmatpush3.bf16.msra.mxu0 %v2704_v37  ;;  %2552 = vmatpush3.bf16.msra.mxu1 %v2705_v39 }
 0x43e   :  { %2531 = vmatprep.subr.bf16.mxu0 %v2706_v10  ;;  %2553 = vmatprep.subr.bf16.mxu1 %v2707_v0 }
 0x441   :  { %2532 = vmatpush3.bf16.msra.mxu0 %v2708_v11  ;;  %2554 = vmatpush3.bf16.msra.mxu1 %v2709_v23 }
 0x442   :  { %2533 = vmatprep.subr.bf16.mxu0 %v2710_v13  ;;  %2555 = vmatprep.subr.bf16.mxu1 %v2711_v41 }
 0x445   :  { %2534 = vmatpush3.bf16.msra.mxu0 %v2712_v43  ;;  %2556 = vmatpush3.bf16.msra.mxu1 %v2713_v27  ;;  %v2748_v43 = vld [vmem:[#allocation8 + $0x138] sm:$0xff]  }
 0x446   :  { %2535 = vmatprep.subr.bf16.mxu0 %v2714_v5  ;;  %2557 = vmatprep.subr.bf16.mxu1 %v2715_v38  ;;  %v2749_v27 = vld [vmem:[#allocation8 + $0x1b8] sm:$0xff]  }
 0x449   :  { %2536 = vmatpush3.bf16.msra.mxu0 %v2716_v56  ;;  %2558 = vmatpush3.bf16.msra.mxu1 %v2717_v57 }
 0x44a   :  { %2565 = vmatprep.subr.bf16.mxu0 %v2718_v58  ;;  %2587 = vmatprep.subr.bf16.mxu1 %v2719_v59 }
 0x4df   :  { %v1860_v60 = vpop.f32.mrb[32].mxu0  ;;  %v1903_v61 = vpop.f32.mrb[32].mxu1 }
 0x4e0   :  { %v1862_v62 = vpop.f32.mrb[33].mxu0  ;;  %v1905_v63 = vpop.f32.mrb[33].mxu1 }
 0x4e1   :  { %v1864_v1 = vpop.f32.mrb[34].mxu0  ;;  %v1907_v2 = vpop.f32.mrb[34].mxu1 }
 0x4e2   :  { %v2000_v3 = vpack.c.bf16 %v1864_v1, %v1860_v60  ;;  %v2002_v4 = vpack.c.bf16 %v1907_v2, %v1903_v61  ;;  %v1866_v40 = vpop.f32.mrb[35].mxu0  ;;  %v1909_v44 = vpop.f32.mrb[35].mxu1 }
 0x4e3   :  { %v2001_v45 = vpack.c.bf16 %v1866_v40, %v1862_v62  ;;  %v2003_v6 = vpack.c.bf16 %v1909_v44, %v1905_v63 }
 0x4e5   :  { %2040 = vmatprep.mubr.bf16.mxu0 %v2001_v45  ;;  %2081 = vmatprep.mubr.bf16.mxu1 %v2003_v6 }
 0x4e6   :  { %2041 = vmatmul.mubr.bf16.vlgmr.msra.gmra.mrb[40].mxu0 %v2000_v3  ;;  %2082 = vmatmul.mubr.bf16.vlgmr.msra.gmra.mrb[40].mxu1 %v2002_v4 }
 0x4e7   :  { %2566 = vmatpush3.bf16.msra.mxu0 %v2720_v12  ;;  %2588 = vmatpush3.bf16.msra.mxu1 %v2721_v16 }
 0x4e8   :  { %2567 = vmatprep.subr.bf16.mxu0 %v2722_v17  ;;  %2589 = vmatprep.subr.bf16.mxu1 %v2723_v22 }
 0x4eb   :  { %2568 = vmatpush3.bf16.msra.mxu0 %v2724_v28  ;;  %2590 = vmatpush3.bf16.msra.mxu1 %v2725_v31 }
 0x4ec   :  { %2569 = vmatprep.subr.bf16.mxu0 %v2726_v32  ;;  %2591 = vmatprep.subr.bf16.mxu1 %v2727_v34 }
 0x4ef   :  { %2570 = vmatpush3.bf16.msra.mxu0 %v2728_v46  ;;  %2592 = vmatpush3.bf16.msra.mxu1 %v2729_v47  ;;  %v1998_v47 = vadd.f32 %v3497_v35, %v3269_v30 }
 0x4f0   :  { %2571 = vmatprep.subr.bf16.mxu0 %v2730_v48  ;;  %2593 = vmatprep.subr.bf16.mxu1 %v2731_v49 }
 0x4f3   :  { %2572 = vmatpush3.bf16.msra.mxu0 %v2732_v50  ;;  %2594 = vmatpush3.bf16.msra.mxu1 %v2733_v51  ;;  %v1999_v51 = vadd.f32 %v3499_v36, %v3271_v29 }
 0x4f4   :  { %2573 = vmatprep.subr.bf16.mxu0 %v2734_v25  ;;  %2595 = vmatprep.subr.bf16.mxu1 %v2735_v21 }
 0x4f7   :  { %2574 = vmatpush3.bf16.msra.mxu0 %v2736_v42  ;;  %2596 = vmatpush3.bf16.msra.mxu1 %v2737_v7 }
 0x4f8   :  { %2575 = vmatprep.subr.bf16.mxu0 %v2738_v52  ;;  %2597 = vmatprep.subr.bf16.mxu1 %v2739_v33 }
 0x4fb   :  { %2576 = vmatpush3.bf16.msra.mxu0 %v2740_v53  ;;  %2598 = vmatpush3.bf16.msra.mxu1 %v2741_v54 }
 0x4fc   :  { %2577 = vmatprep.subr.bf16.mxu0 %v2742_v55  ;;  %2599 = vmatprep.subr.bf16.mxu1 %v2743_v24 }
 0x4ff   :  { %v1946_v26 = vpop.f32.mrb[36].mxu0  ;;  %v1989_v8 = vpop.f32.mrb[36].mxu1  ;;  %2578 = vmatpush3.bf16.msra.mxu0 %v2744_v20  ;;  %2600 = vmatpush3.bf16.msra.mxu1 %v2745_v15 }
 0x500   :  { %v1948_v14 = vpop.f32.mrb[37].mxu0  ;;  %v1991_v9 = vpop.f32.mrb[37].mxu1  ;;  %2579 = vmatprep.subr.bf16.mxu0 %v2746_v18  ;;  %2601 = vmatprep.subr.bf16.mxu1 %v2747_v19 }
 0x501   :  { %v1950_v37 = vpop.f32.mrb[38].mxu0  ;;  %v1993_v39 = vpop.f32.mrb[38].mxu1 }
 0x502   :  { %v2004_v10 = vpack.c.bf16 %v1950_v37, %v1946_v26  ;;  %v2006_v0 = vpack.c.bf16 %v1993_v39, %v1989_v8  ;;  %v1952_v11 = vpop.f32.mrb[39].mxu0  ;;  %v1995_v23 = vpop.f32.mrb[39].mxu1 }
 0x503   :  { %v2005_v13 = vpack.c.bf16 %v1952_v11, %v1948_v14  ;;  %v2007_v41 = vpack.c.bf16 %v1995_v23, %v1991_v9  ;;  %2580 = vmatpush3.bf16.msra.mxu0 %v2748_v43  ;;  %2602 = vmatpush3.bf16.msra.mxu1 %v2749_v27 }
 0x505   :  { %2122 = vmatprep.mubr.bf16.mxu0 %v2005_v13  ;;  %2163 = vmatprep.mubr.bf16.mxu1 %v2007_v41 }
 0x506   :  { %2123 = vmatmul.mubr.bf16.vlgmr.msra.gmra.mrb[44].mxu0 %v2004_v10  ;;  %2164 = vmatmul.mubr.bf16.vlgmr.msra.gmra.mrb[44].mxu1 %v2006_v0 }
 0x5b9   :  { %v2537_v5 = vpop.f32.mrb[40].mxu0  ;;  %v2559_v38 = vpop.f32.mrb[40].mxu1 }
 0x5ba   :  { %v2538_v56 = vpop.f32.mrb[41].mxu0  ;;  %v2560_v57 = vpop.f32.mrb[41].mxu1 }
 0x5bb   :  { %v2539_v58 = vadd.f32 %v2538_v56, %v2537_v5  ;;  %v2561_v59 = vadd.f32 %v2560_v57, %v2559_v38  ;;  %v2540_v60 = vpop.f32.mrb[42].mxu0  ;;  %v2562_v61 = vpop.f32.mrb[42].mxu1 }
 0x5bc   :  { %v2541_v62 = vpop.f32.mrb[43].mxu0  ;;  %v2563_v63 = vpop.f32.mrb[43].mxu1 }
 0x5bd   :  { %v2084_v1 = vadd.f32 %v2561_v59, %v2539_v58  ;;  %v2542_v2 = vadd.f32 %v2541_v62, %v2540_v60  ;;  %v2564_v3 = vadd.f32 %v2563_v63, %v2562_v61 }
 0x5bf   :  { %v2087_v4 = vadd.f32 %v2564_v3, %v2542_v2 }
 0x5d9   :  { %v2581_v40 = vpop.f32.mrb[44].mxu0  ;;  %v2603_v44 = vpop.f32.mrb[44].mxu1 }
 0x5da   :  { %v2582_v45 = vpop.f32.mrb[45].mxu0  ;;  %v2604_v6 = vpop.f32.mrb[45].mxu1 }
 0x5db   :  { %v2583_v12 = vadd.f32 %v2582_v45, %v2581_v40  ;;  %v2605_v16 = vadd.f32 %v2604_v6, %v2603_v44  ;;  %v2584_v17 = vpop.f32.mrb[46].mxu0  ;;  %v2606_v22 = vpop.f32.mrb[46].mxu1 }
 0x5dc   :  { %v2585_v28 = vpop.f32.mrb[47].mxu0  ;;  %v2607_v31 = vpop.f32.mrb[47].mxu1 }
 0x5dd   :  { %v2125_v32 = vadd.f32 %v2583_v12, %v2084_v1  ;;  %v2586_v34 = vadd.f32 %v2585_v28, %v2584_v17  ;;  %v2608_v46 = vadd.f32 %v2607_v31, %v2606_v22 }
 0x5df   :  { %v2166_v48 = vadd.f32 %v2605_v16, %v2125_v32  ;;  %v2128_v49 = vadd.f32 %v2586_v34, %v2087_v4 }
 0x5e1   :  { %v2172_v50 = vadd.f32 %v2166_v48, %v1998_v47  ;;  %v2169_v25 = vadd.f32 %v2608_v46, %v2128_v49 }
 0x5e3   :  { %2174 = vst [vmem:[#allocation10] sm:$0xff] %v2172_v50  ;;  %v2173_v21 = vadd.f32 %v2169_v25, %v1999_v51 }
 0x5e5   :  { %2175 = vst [vmem:[#allocation10 + $0x8] sm:$0xff] %v2173_v21 }
 0x5e6   :  { %2849 = shalt.err (!%p2846_p8)
}
 0x5e7   :  { %s2850_s27 = scalar_lea.hbm %s3569_s6, 256 }
 0x5e8   :  { %p2851_p9 = scmp.ne.s32.totalorder %s3569_s6, %s2850_s27  ;;  %p2854_p10 = scmp.lt.u32.totalorder %s2850_s27, %s3569_s6 }
 0x5ea   :  { %p2856_p11 = pnand %p2854_p10, %p2851_p9 }
 0x5ec   :  { %2859 = shalt.err (!%p2856_p11)
}
 0x5ed   :  { %s2878_s10 = smov 128   ;;  %s2879_s11 = smov 8  }
 0x5ee   :  { %2187 = dma.vmem_to_hbm [thread:$0]  %s2182_s21, 256, %s3569_s6, [#allocation4], %s2878_s10, %s2878_s10, %s2879_s11  }
 0x5ef   :  { %2866 = dma.done.wait [#allocation4], 256  }
 0x5f0   :  { %2867 = vsyncadd [#allocation4], 4294967040 }
 0x5f1   :  { %2191 = vsyncpa [#allocation3], 1 }
 0x5f2   :  { %2192 = vsyncpa [#allocation6], 1 }
 0x5f3   :  { %2193 = vsyncpa [#allocation9], 1 }
 0x5f4   :  { %2194 = vsyncpa [#allocation4], 1 }

</bundles_post_ra>
